<compile_context>
chip_gen: v7x
topology: tpu7x:2x2x1
jax: 0.10.0
libtpu: 0.0.40
codegen_flags: <defaults>
</compile_context>

<pallas_src>
import jax
import jax.numpy as jnp
from jax.experimental import pallas as pl
from jax.experimental.pallas import tpu as pltpu

EMBED_DIM = 50      # lib.embedding_dim — BatchNorm1d(50) implies 50
D_PAD = 128         # feature dim padded to one full lane width
BN_EPS = 1e-5
TB = 128            # batch tile: rows of indices / output lanes per grid step


def _transe_kernel(h_ref, t_ref, r_ref, h2_ref, t2_ref, r2_ref,
                   e_tab_ref, rel_tab_ref,
                   gamma_ref, beta_ref, mean_ref, var_ref,
                   good_ref, bad_ref):
    """One batch tile: fused one-hot gather (2 MXU matmuls), folded BN affine, L1 reduce."""
    tb = h_ref.shape[0]

    # Eval-mode BN is affine, so BN(h)+BN(r)-BN(t) == (h+r-t)*scale + shift (exact).
    # Padded lanes: gamma/beta/mean padded with 0, var with 1 -> scale = shift = 0 there,
    # so padded lanes contribute nothing to the L1 sum.
    scale = gamma_ref[...] * jax.lax.rsqrt(var_ref[...] + BN_EPS)      # (1, D_PAD)
    shift = beta_ref[...] - mean_ref[...] * scale                      # (1, D_PAD)

    def gather(idx_col, tab_ref):
        # gather-as-matmul: tables are VMEM-resident at these sizes; MXU-friendly.
        n_rows = tab_ref.shape[0]
        row_ids = jax.lax.broadcasted_iota(jnp.int32, (idx_col.shape[0], n_rows), 1)
        onehot = (row_ids == idx_col).astype(tab_ref.dtype)            # (M, n_rows)
        return jnp.dot(onehot, tab_ref[...], preferred_element_type=jnp.float32)

    # Fuse the 4 entity lookups and the 2 relation lookups into one matmul each.
    ent_idx = jnp.concatenate(
        [h_ref[...], t_ref[...], h2_ref[...], t2_ref[...]], axis=0)    # (4*tb, 1) int32
    rel_idx = jnp.concatenate([r_ref[...], r2_ref[...]], axis=0)       # (2*tb, 1) int32

    ent = gather(ent_idx, e_tab_ref)                                   # (4*tb, D_PAD) f32
    rel = gather(rel_idx, rel_tab_ref)                                 # (2*tb, D_PAD) f32

    h, t = ent[0:tb], ent[tb:2 * tb]
    h2, t2 = ent[2 * tb:3 * tb], ent[3 * tb:4 * tb]
    r, r2 = rel[0:tb], rel[tb:2 * tb]

    good = jnp.sum(jnp.abs((h + r - t) * scale + shift), axis=-1)      # (tb,)
    bad = jnp.sum(jnp.abs((h2 + r2 - t2) * scale + shift), axis=-1)    # (tb,)

    # Lane-dense stores: batch lives on the lane axis of a (1, tb) row.
    good_ref[...] = good.reshape(1, tb)
    bad_ref[...] = bad.reshape(1, tb)


def transe_forward(h, t, r, h2, t2, r2, params):
    B = h.shape[0]
    b_pad = ((B + TB - 1) // TB) * TB

    def prep_idx(x):
        x = x.astype(jnp.int32).reshape(-1)
        x = jnp.pad(x, (0, b_pad - B))                  # padded rows use index 0 (valid)
        return x.reshape(b_pad, 1)

    def prep_tab(tab):
        tab = tab.astype(jnp.float32)
        n, d = tab.shape
        n_pad = ((n + 7) // 8) * 8                      # sublane-align the row count
        return jnp.pad(tab, ((0, n_pad - n), (0, D_PAD - d)))

    def prep_bn(x, pad_value=0.0):
        x = x.astype(jnp.float32).reshape(1, -1)
        return jnp.pad(x, ((0, 0), (0, D_PAD - x.shape[1])), constant_values=pad_value)

    args = [prep_idx(h), prep_idx(t), prep_idx(r),
            prep_idx(h2), prep_idx(t2), prep_idx(r2),
            prep_tab(params["e_emb"]), prep_tab(params["rel_emb"]),
            prep_bn(params["bn_gamma"]), prep_bn(params["bn_beta"]),
            prep_bn(params["bn_mean"]), prep_bn(params["bn_var"], pad_value=1.0)]

    n_ent = args[6].shape[0]
    n_rel = args[7].shape[0]

    idx_spec = pl.BlockSpec((TB, 1), lambda i: (i, 0))
    full = lambda shape: pl.BlockSpec(shape, lambda i: (0, 0))  # resident across the grid
    in_specs = ([idx_spec] * 6
                + [full((n_ent, D_PAD)), full((n_rel, D_PAD))]
                + [full((1, D_PAD))] * 4)
    out_spec = pl.BlockSpec((1, TB), lambda i: (0, i))

    good, bad = pl.pallas_call(
        _transe_kernel,
        grid=(b_pad // TB,),
        in_specs=in_specs,
        out_specs=(out_spec, out_spec),
        out_shape=(jax.ShapeDtypeStruct((1, b_pad), jnp.float32),
                   jax.ShapeDtypeStruct((1, b_pad), jnp.float32)),
        compiler_params=pltpu.CompilerParams(dimension_semantics=("parallel",)),
    )(*args)
    return good[0, :B], bad[0, :B]


def _reference(h, t, r, h2, t2, r2, params):
    """Pure-JAX reference of the same (eval-mode) forward."""
    def emb(tab, idx):
        return jnp.take(tab, idx, axis=0)

    def bn(x):
        inv = jax.lax.rsqrt(params["bn_var"] + BN_EPS)
        return (x - params["bn_mean"]) * inv * params["bn_gamma"] + params["bn_beta"]

    def score(a, b, c):
        return jnp.sum(jnp.abs(a + c - b), axis=-1)

    H, T, R = bn(emb(params["e_emb"], h)), bn(emb(params["e_emb"], t)), bn(emb(params["rel_emb"], r))
    H2, T2, R2 = bn(emb(params["e_emb"], h2)), bn(emb(params["e_emb"], t2)), bn(emb(params["rel_emb"], r2))
    return score(H, T, R), score(H2, T2, R2)


def _xavier_uniform(key, shape):
    fan_in, fan_out = shape[0], shape[1]
    bound = (6.0 / (fan_in + fan_out)) ** 0.5
    return jax.random.uniform(key, shape, jnp.float32, -bound, bound)


if __name__ == "__main__":
    entity_len, rel_len, batch = 64, 16, 8
    key = jax.random.PRNGKey(0)
    k_e, k_r, k_g, k_b, k_m, k_v, k_idx = jax.random.split(key, 7)

    params = {
        "e_emb": _xavier_uniform(k_e, (entity_len, EMBED_DIM)),
        "rel_emb": _xavier_uniform(k_r, (rel_len, EMBED_DIM)),
        "bn_gamma": jax.random.uniform(k_g, (EMBED_DIM,), jnp.float32, 0.8, 1.2),
        "bn_beta": jax.random.uniform(k_b, (EMBED_DIM,), jnp.float32, -0.1, 0.1),
        "bn_mean": jax.random.uniform(k_m, (EMBED_DIM,), jnp.float32, -0.05, 0.05),
        "bn_var": jax.random.uniform(k_v, (EMBED_DIM,), jnp.float32, 0.5, 1.5),
    }

    ks = jax.random.split(k_idx, 6)
    h = jax.random.randint(ks[0], (batch,), 0, entity_len, jnp.int32)
    t = jax.random.randint(ks[1], (batch,), 0, entity_len, jnp.int32)
    r = jax.random.randint(ks[2], (batch,), 0, rel_len, jnp.int32)
    h2 = jax.random.randint(ks[3], (batch,), 0, entity_len, jnp.int32)
    t2 = jax.random.randint(ks[4], (batch,), 0, entity_len, jnp.int32)
    r2 = jax.random.randint(ks[5], (batch,), 0, rel_len, jnp.int32)

    good, bad = transe_forward(h, t, r, h2, t2, r2, params)
    jax.block_until_ready((good, bad))

    ref_good, ref_bad = _reference(h, t, r, h2, t2, r2, params)
    assert jnp.allclose(good, ref_good, atol=1e-4, rtol=1e-4), (good, ref_good)
    assert jnp.allclose(bad, ref_bad, atol=1e-4, rtol=1e-4), (bad, ref_bad)

    print("KERNEL_OK")
</pallas_src>

<mosaic_0001>
module attributes {stable_mosaic.version = 11 : i64} {
  func.func @_transe_kernel(%arg0: i32, %arg1: memref<128x1xi32, #tpu.memory_space<vmem>>, %arg2: memref<128x1xi32, #tpu.memory_space<vmem>>, %arg3: memref<128x1xi32, #tpu.memory_space<vmem>>, %arg4: memref<128x1xi32, #tpu.memory_space<vmem>>, %arg5: memref<128x1xi32, #tpu.memory_space<vmem>>, %arg6: memref<128x1xi32, #tpu.memory_space<vmem>>, %arg7: memref<64x128xf32, #tpu.memory_space<vmem>>, %arg8: memref<16x128xf32, #tpu.memory_space<vmem>>, %arg9: memref<1x128xf32, #tpu.memory_space<vmem>>, %arg10: memref<1x128xf32, #tpu.memory_space<vmem>>, %arg11: memref<1x128xf32, #tpu.memory_space<vmem>>, %arg12: memref<1x128xf32, #tpu.memory_space<vmem>>, %arg13: memref<1x128xf32, #tpu.memory_space<vmem>>, %arg14: memref<1x128xf32, #tpu.memory_space<vmem>>) attributes {dimension_semantics = [#tpu.dimension_semantics<parallel>], iteration_bounds = array<i64: 1>, scalar_prefetch = 0 : i64, scratch_operands = 0 : i64, tpu.core_type = #tpu.core_type<tc>, window_params = [{transform_indices = @transform_0, window_bounds = array<i64: 128, 1>}, {transform_indices = @transform_1, window_bounds = array<i64: 128, 1>}, {transform_indices = @transform_2, window_bounds = array<i64: 128, 1>}, {transform_indices = @transform_3, window_bounds = array<i64: 128, 1>}, {transform_indices = @transform_4, window_bounds = array<i64: 128, 1>}, {transform_indices = @transform_5, window_bounds = array<i64: 128, 1>}, {pipeline_mode = #tpu.pipeline_mode<synchronous>, transform_indices = @transform_6, window_bounds = array<i64: 64, 128>}, {pipeline_mode = #tpu.pipeline_mode<synchronous>, transform_indices = @transform_7, window_bounds = array<i64: 16, 128>}, {pipeline_mode = #tpu.pipeline_mode<synchronous>, transform_indices = @transform_8, window_bounds = array<i64: 1, 128>}, {pipeline_mode = #tpu.pipeline_mode<synchronous>, transform_indices = @transform_9, window_bounds = array<i64: 1, 128>}, {pipeline_mode = #tpu.pipeline_mode<synchronous>, transform_indices = @transform_10, window_bounds = array<i64: 1, 128>}, {pipeline_mode = #tpu.pipeline_mode<synchronous>, transform_indices = @transform_11, window_bounds = array<i64: 1, 128>}, {transform_indices = @transform_12, window_bounds = array<i64: 1, 128>}, {transform_indices = @transform_13, window_bounds = array<i64: 1, 128>}]} {
    %c0 = arith.constant 0 : index
    %c0_0 = arith.constant 0 : index
    %0 = vector.load %arg9[%c0, %c0_0] : memref<1x128xf32, #tpu.memory_space<vmem>>, vector<1x128xf32>
    %c0_1 = arith.constant 0 : index
    %c0_2 = arith.constant 0 : index
    %1 = vector.load %arg12[%c0_1, %c0_2] : memref<1x128xf32, #tpu.memory_space<vmem>>, vector<1x128xf32>
    %cst = arith.constant 9.99999974E-6 : f32
    %2 = vector.broadcast %cst : f32 to vector<1x128xf32>
    %3 = arith.addf %1, %2 : vector<1x128xf32>
    %4 = math.rsqrt %3 : vector<1x128xf32>
    %5 = arith.mulf %0, %4 : vector<1x128xf32>
    %c0_3 = arith.constant 0 : index
    %c0_4 = arith.constant 0 : index
    %6 = vector.load %arg10[%c0_3, %c0_4] : memref<1x128xf32, #tpu.memory_space<vmem>>, vector<1x128xf32>
    %c0_5 = arith.constant 0 : index
    %c0_6 = arith.constant 0 : index
    %7 = vector.load %arg11[%c0_5, %c0_6] : memref<1x128xf32, #tpu.memory_space<vmem>>, vector<1x128xf32>
    %8 = arith.mulf %7, %5 : vector<1x128xf32>
    %9 = arith.subf %6, %8 : vector<1x128xf32>
    %c0_7 = arith.constant 0 : index
    %c0_8 = arith.constant 0 : index
    %10 = vector.load %arg1[%c0_7, %c0_8] : memref<128x1xi32, #tpu.memory_space<vmem>>, vector<128x1xi32>
    %c0_9 = arith.constant 0 : index
    %c0_10 = arith.constant 0 : index
    %11 = vector.load %arg2[%c0_9, %c0_10] : memref<128x1xi32, #tpu.memory_space<vmem>>, vector<128x1xi32>
    %c0_11 = arith.constant 0 : index
    %c0_12 = arith.constant 0 : index
    %12 = vector.load %arg4[%c0_11, %c0_12] : memref<128x1xi32, #tpu.memory_space<vmem>>, vector<128x1xi32>
    %c0_13 = arith.constant 0 : index
    %c0_14 = arith.constant 0 : index
    %13 = vector.load %arg5[%c0_13, %c0_14] : memref<128x1xi32, #tpu.memory_space<vmem>>, vector<128x1xi32>
    %14 = tpu.concatenate %10, %11, %12, %13 in 0 : vector<128x1xi32>, vector<128x1xi32>, vector<128x1xi32>, vector<128x1xi32> -> vector<512x1xi32>
    %c0_15 = arith.constant 0 : index
    %c0_16 = arith.constant 0 : index
    %15 = vector.load %arg3[%c0_15, %c0_16] : memref<128x1xi32, #tpu.memory_space<vmem>>, vector<128x1xi32>
    %c0_17 = arith.constant 0 : index
    %c0_18 = arith.constant 0 : index
    %16 = vector.load %arg6[%c0_17, %c0_18] : memref<128x1xi32, #tpu.memory_space<vmem>>, vector<128x1xi32>
    %17 = tpu.concatenate %15, %16 in 0 : vector<128x1xi32>, vector<128x1xi32> -> vector<256x1xi32>
    %18 = tpu.iota {dimensions = array<i32: 1>} : vector<512x64xi32>
    %19 = vector.broadcast %14 : vector<512x1xi32> to vector<512x64xi32>
    %20 = arith.cmpi eq, %18, %19 : vector<512x64xi32>
    %21 = arith.extui %20 : vector<512x64xi1> to vector<512x64xi32>
    %22 = arith.sitofp %21 : vector<512x64xi32> to vector<512x64xf32>
    %c0_19 = arith.constant 0 : index
    %c0_20 = arith.constant 0 : index
    %23 = vector.load %arg7[%c0_19, %c0_20] : memref<64x128xf32, #tpu.memory_space<vmem>>, vector<64x128xf32>
    %cst_21 = arith.constant dense<0.000000e+00> : vector<512x128xf32>
    %24 = tpu.matmul %22, %23, %cst_21 {dimension_numbers = #tpu.dot_dimension_numbers<[1], [0], [0], [1], [0, 0, 1, 1], [], []>} : vector<512x64xf32>, vector<64x128xf32>, vector<512x128xf32> -> vector<512x128xf32>
    %25 = tpu.iota {dimensions = array<i32: 1>} : vector<256x16xi32>
    %26 = vector.broadcast %17 : vector<256x1xi32> to vector<256x16xi32>
    %27 = arith.cmpi eq, %25, %26 : vector<256x16xi32>
    %28 = arith.extui %27 : vector<256x16xi1> to vector<256x16xi32>
    %29 = arith.sitofp %28 : vector<256x16xi32> to vector<256x16xf32>
    %c0_22 = arith.constant 0 : index
    %c0_23 = arith.constant 0 : index
    %30 = vector.load %arg8[%c0_22, %c0_23] : memref<16x128xf32, #tpu.memory_space<vmem>>, vector<16x128xf32>
    %cst_24 = arith.constant dense<0.000000e+00> : vector<256x128xf32>
    %31 = tpu.matmul %29, %30, %cst_24 {dimension_numbers = #tpu.dot_dimension_numbers<[1], [0], [0], [1], [0, 0, 1, 1], [], []>} : vector<256x16xf32>, vector<16x128xf32>, vector<256x128xf32> -> vector<256x128xf32>
    %32 = vector.extract_strided_slice %24 {offsets = [0, 0], sizes = [128, 128], strides = [1, 1]} : vector<512x128xf32> to vector<128x128xf32>
    %33 = vector.extract_strided_slice %24 {offsets = [128, 0], sizes = [128, 128], strides = [1, 1]} : vector<512x128xf32> to vector<128x128xf32>
    %34 = vector.extract_strided_slice %24 {offsets = [256, 0], sizes = [128, 128], strides = [1, 1]} : vector<512x128xf32> to vector<128x128xf32>
    %35 = vector.extract_strided_slice %24 {offsets = [384, 0], sizes = [128, 128], strides = [1, 1]} : vector<512x128xf32> to vector<128x128xf32>
    %36 = vector.extract_strided_slice %31 {offsets = [0, 0], sizes = [128, 128], strides = [1, 1]} : vector<256x128xf32> to vector<128x128xf32>
    %37 = vector.extract_strided_slice %31 {offsets = [128, 0], sizes = [128, 128], strides = [1, 1]} : vector<256x128xf32> to vector<128x128xf32>
    %38 = arith.addf %32, %36 : vector<128x128xf32>
    %39 = arith.subf %38, %33 : vector<128x128xf32>
    %40 = vector.broadcast %5 : vector<1x128xf32> to vector<128x128xf32>
    %41 = arith.mulf %39, %40 : vector<128x128xf32>
    %42 = vector.broadcast %9 : vector<1x128xf32> to vector<128x128xf32>
    %43 = arith.addf %41, %42 : vector<128x128xf32>
    %44 = math.absf %43 : vector<128x128xf32>
    %cst_25 = arith.constant dense<0.000000e+00> : vector<128xf32>
    %45 = vector.multi_reduction <add>, %44, %cst_25 [1] : vector<128x128xf32> to vector<128xf32>
    %46 = arith.addf %34, %37 : vector<128x128xf32>
    %47 = arith.subf %46, %35 : vector<128x128xf32>
    %48 = vector.broadcast %5 : vector<1x128xf32> to vector<128x128xf32>
    %49 = arith.mulf %47, %48 : vector<128x128xf32>
    %50 = vector.broadcast %9 : vector<1x128xf32> to vector<128x128xf32>
    %51 = arith.addf %49, %50 : vector<128x128xf32>
    %52 = math.absf %51 : vector<128x128xf32>
    %cst_26 = arith.constant dense<0.000000e+00> : vector<128xf32>
    %53 = vector.multi_reduction <add>, %52, %cst_26 [1] : vector<128x128xf32> to vector<128xf32>
    %54 = vector.shape_cast %45 : vector<128xf32> to vector<1x128xf32>
    %c0_27 = arith.constant 0 : index
    %c0_28 = arith.constant 0 : index
    %55 = vector.load %arg13[%c0_27, %c0_28] : memref<1x128xf32, #tpu.memory_space<vmem>>, vector<1x128xf32>
    tpu.vector_store %arg13[%c0_27, %c0_28], %54 {strides = array<i32>} : memref<1x128xf32, #tpu.memory_space<vmem>>, vector<1x128xf32>,
    %56 = vector.shape_cast %53 : vector<128xf32> to vector<1x128xf32>
    %c0_29 = arith.constant 0 : index
    %c0_30 = arith.constant 0 : index
    %57 = vector.load %arg14[%c0_29, %c0_30] : memref<1x128xf32, #tpu.memory_space<vmem>>, vector<1x128xf32>
    tpu.vector_store %arg14[%c0_29, %c0_30], %56 {strides = array<i32>} : memref<1x128xf32, #tpu.memory_space<vmem>>, vector<1x128xf32>,
    return
  }
  func.func @transform_0(%arg0: i32) -> (i32, i32) {
    %c0_i32 = arith.constant 0 : i32
    %c0_i32_0 = arith.constant 0 : i32
    return %arg0, %c0_i32 : i32, i32
  }
  func.func @transform_1(%arg0: i32) -> (i32, i32) {
    %c0_i32 = arith.constant 0 : i32
    %c0_i32_0 = arith.constant 0 : i32
    return %arg0, %c0_i32 : i32, i32
  }
  func.func @transform_2(%arg0: i32) -> (i32, i32) {
    %c0_i32 = arith.constant 0 : i32
    %c0_i32_0 = arith.constant 0 : i32
    return %arg0, %c0_i32 : i32, i32
  }
  func.func @transform_3(%arg0: i32) -> (i32, i32) {
    %c0_i32 = arith.constant 0 : i32
    %c0_i32_0 = arith.constant 0 : i32
    return %arg0, %c0_i32 : i32, i32
  }
  func.func @transform_4(%arg0: i32) -> (i32, i32) {
    %c0_i32 = arith.constant 0 : i32
    %c0_i32_0 = arith.constant 0 : i32
    return %arg0, %c0_i32 : i32, i32
  }
  func.func @transform_5(%arg0: i32) -> (i32, i32) {
    %c0_i32 = arith.constant 0 : i32
    %c0_i32_0 = arith.constant 0 : i32
    return %arg0, %c0_i32 : i32, i32
  }
  func.func @transform_6(%arg0: i32) -> (i32, i32) {
    %c0_i32 = arith.constant 0 : i32
    %c0_i32_0 = arith.constant 0 : i32
    %c0_i32_1 = arith.constant 0 : i32
    return %c0_i32, %c0_i32_0 : i32, i32
  }
  func.func @transform_7(%arg0: i32) -> (i32, i32) {
    %c0_i32 = arith.constant 0 : i32
    %c0_i32_0 = arith.constant 0 : i32
    %c0_i32_1 = arith.constant 0 : i32
    return %c0_i32, %c0_i32_0 : i32, i32
  }
  func.func @transform_8(%arg0: i32) -> (i32, i32) {
    %c0_i32 = arith.constant 0 : i32
    %c0_i32_0 = arith.constant 0 : i32
    %c0_i32_1 = arith.constant 0 : i32
    return %c0_i32, %c0_i32_0 : i32, i32
  }
  func.func @transform_9(%arg0: i32) -> (i32, i32) {
    %c0_i32 = arith.constant 0 : i32
    %c0_i32_0 = arith.constant 0 : i32
    %c0_i32_1 = arith.constant 0 : i32
    return %c0_i32, %c0_i32_0 : i32, i32
  }
  func.func @transform_10(%arg0: i32) -> (i32, i32) {
    %c0_i32 = arith.constant 0 : i32
    %c0_i32_0 = arith.constant 0 : i32
    %c0_i32_1 = arith.constant 0 : i32
    return %c0_i32, %c0_i32_0 : i32, i32
  }
  func.func @transform_11(%arg0: i32) -> (i32, i32) {
    %c0_i32 = arith.constant 0 : i32
    %c0_i32_0 = arith.constant 0 : i32
    %c0_i32_1 = arith.constant 0 : i32
    return %c0_i32, %c0_i32_0 : i32, i32
  }
  func.func @transform_12(%arg0: i32) -> (i32, i32) {
    %c0_i32 = arith.constant 0 : i32
    %c0_i32_0 = arith.constant 0 : i32
    return %c0_i32, %arg0 : i32, i32
  }
  func.func @transform_13(%arg0: i32) -> (i32, i32) {
    %c0_i32 = arith.constant 0 : i32
    %c0_i32_0 = arith.constant 0 : i32
    return %c0_i32, %arg0 : i32, i32
  }
}

</mosaic_0001>

<bundles_post_ra>
// kernel: tpu_custom_call.1
= control target key start
LH: loop header
LB: loop body
LE: loop exit
PB: predicated region body
PF: predicated region fallthrough
CT: control target
= control target key end

     0   :  { %19 = vsyncpa [#allocation3], 0  ;;  %v2704_v2 = vmov 0   ;;  %s3703_s0 = inlined_call_operand.vmem [shape: s32[128,1], index: 0, kind: input, shape index: {}]   ;;  %s3704_s1 = inlined_call_operand.vmem [shape: s32[128,1], index: 1, kind: input, shape index: {}]   ;;  %s3705_s2 = inlined_call_operand.vmem [shape: s32[128,1], index: 2, kind: input, shape index: {}]   ;;  %s3706_s3 = inlined_call_operand.vmem [shape: s32[128,1], index: 3, kind: input, shape index: {}]   ;;  %s3707_s4 = inlined_call_operand.vmem [shape: s32[128,1], index: 4, kind: input, shape index: {}]   ;;  %s3708_s5 = inlined_call_operand.vmem [shape: s32[128,1], index: 5, kind: input, shape index: {}]   ;;  %s3709_s6 = inlined_call_operand.vmem [shape: f32[64,128], index: 6, kind: input, shape index: {}]   ;;  %s3710_s7 = inlined_call_operand.vmem [shape: f32[16,128], index: 7, kind: input, shape index: {}]   ;;  %s3711_s8 = inlined_call_operand.vmem [shape: f32[1,128], index: 8, kind: input, shape index: {}]   ;;  %s3712_s9 = inlined_call_operand.vmem [shape: f32[1,128], index: 9, kind: input, shape index: {}]   ;;  %s3713_s10 = inlined_call_operand.vmem [shape: f32[1,128], index: 10, kind: input, shape index: {}]   ;;  %s3714_s11 = inlined_call_operand.vmem [shape: f32[1,128], index: 11, kind: input, shape index: {}]   ;;  %s3715_s12 = inlined_call_operand.hbm [shape: f32[1,128], index: 12, kind: output, shape index: {0}]   ;;  %s3716_s13 = inlined_call_operand.hbm [shape: f32[1,128], index: 13, kind: output, shape index: {1}]  }
   0x1   :  { %v70_v0 = vld [vmem:[%s3704_s1] sm:$0xff]  ;;  %2653 = vset.pattern.permute.xlu1 %v2704_v2  ;;  %2652 = vset.pattern.permute.xlu0 %v2704_v2  ;;  %v71_v3 = vld [vmem:[%s3704_s1 + $0x8] sm:$0xff]  ;;  %v57_v5 = vld [vmem:[%s3703_s0 + $0x18] sm:$0xff] }
   0x2   :  { %v54_v1 = vld [vmem:[%s3703_s0] sm:$0xff]  ;;  %201 = vperm.xlu1 %2653, %v70_v0   ;;  %v55_v4 = vld [vmem:[%s3703_s0 + $0x8] sm:$0xff]  ;;  %v56_v6 = vld [vmem:[%s3703_s0 + $0x10] sm:$0xff] }
   0x3   :  { %153 = vperm.xlu0 %2652, %v54_v1   ;;  %v73_v7 = vld [vmem:[%s3704_s1 + $0x18] sm:$0xff]  ;;  %v72_v8 = vld [vmem:[%s3704_s1 + $0x10] sm:$0xff]  ;;  %v59_v9 = vld [vmem:[%s3703_s0 + $0x28] sm:$0xff] }
   0x4   :  { %v58_v10 = vld [vmem:[%s3703_s0 + $0x20] sm:$0xff]  ;;  %v75_v11 = vld [vmem:[%s3704_s1 + $0x28] sm:$0xff]  ;;  %v538_v16 = vld [vmem:[%s3709_s6 + $0x10] sm:$0xff] }
   0x5   :  { %v74_v12 = vld [vmem:[%s3704_s1 + $0x20] sm:$0xff]  ;;  %v537_v14 = vld [vmem:[%s3709_s6 + $0x8] sm:$0xff]  ;;  %v539_v17 = vld [vmem:[%s3709_s6 + $0x18] sm:$0xff] }
   0x6   :  { %204 = vperm.xlu1 %2653, %v71_v3   ;;  %v536_v13 = vld [vmem:[%s3709_s6] sm:$0xff]  ;;  %v2592_v18 = vpack.c.bf16 %v539_v17, %v538_v16  ;;  %v61_v20 = vld [vmem:[%s3703_s0 + $0x38] sm:$0xff]  ;;  %v60_v21 = vld [vmem:[%s3703_s0 + $0x30] sm:$0xff] }
   0x7   :  { %156 = vperm.xlu0 %2652, %v55_v4   ;;  %v2588_v15 = vpack.c.bf16 %v537_v14, %v536_v13  ;;  %v540_v19 = vld [vmem:[%s3709_s6 + $0x20] sm:$0xff]  ;;  %v541_v22 = vld [vmem:[%s3709_s6 + $0x28] sm:$0xff]  ;;  %v542_v24 = vld [vmem:[%s3709_s6 + $0x30] sm:$0xff] }
   0x8   :  { %v2596_v23 = vpack.c.bf16 %v541_v22, %v540_v19  ;;  %v543_v25 = vld [vmem:[%s3709_s6 + $0x38] sm:$0xff]  ;;  %v76_v27 = vld [vmem:[%s3704_s1 + $0x30] sm:$0xff] }
   0x9   :  { %2589 = vmatprep.subr.bf16.mxu0 %v2588_v15  ;;  %2608 = vmatprep.subr.bf16.mxu1 %v2588_v15  ;;  %v77_v26 = vld [vmem:[%s3704_s1 + $0x38] sm:$0xff] }
   0xa   :  { %162 = vperm.xlu1 %2653, %v57_v5   ;;  %2591 = vmatpush3.bf16.msra.mxu0 %v2588_v15 }
   0xb   :  { %159 = vperm.xlu0 %2652, %v56_v6   ;;  %2612 = vmatpush3.bf16.msra.mxu1 %v2588_v15 }
   0xc   :  { %2593 = vmatprep.subr.bf16.mxu0 %v2592_v18  ;;  %2609 = vmatprep.subr.bf16.mxu1 %v2592_v18 }
   0xe   :  { %210 = vperm.xlu1 %2653, %v73_v7   ;;  %2595 = vmatpush3.bf16.msra.mxu0 %v2592_v18 }
   0xf   :  { %207 = vperm.xlu0 %2652, %v72_v8   ;;  %2613 = vmatpush3.bf16.msra.mxu1 %v2592_v18 }
  0x12   :  { %168 = vperm.xlu1 %2653, %v59_v9  }
  0x13   :  { %165 = vperm.xlu0 %2652, %v58_v10  }
  0x16   :  { %216 = vperm.xlu1 %2653, %v75_v11  }
  0x17   :  { %213 = vperm.xlu0 %2652, %v74_v12  }
  0x1a   :  { %174 = vperm.xlu1 %2653, %v61_v20  }
  0x1b   :  { %171 = vperm.xlu0 %2652, %v60_v21  }
  0x1c   :  { %20 = vsyncpa [#allocation5], 0  ;;  %2597 = vmatprep.subr.bf16.mxu0 %v2596_v23  ;;  %2610 = vmatprep.subr.bf16.mxu1 %v2596_v23  ;;  %v2600_v28 = vpack.c.bf16 %v543_v25, %v542_v24  ;;  %v63_v29 = vld [vmem:[%s3703_s0 + $0x48] sm:$0xff]  ;;  %v62_v30 = vld [vmem:[%s3703_s0 + $0x40] sm:$0xff]  ;;  %v150_v14 = vlaneseq  ;;  %vm544_vm0 = vcmask 523264   ;;  %v2705_v22 = vmov 0.0  }
  0x1d   :  { %2599 = vmatpush3.bf16.msra.mxu0 %v2596_v23  ;;  %2614 = vmatpush3.bf16.msra.mxu1 %v2596_v23  ;;  %v79_v31 = vld [vmem:[%s3704_s1 + $0x48] sm:$0xff]  ;;  %v78_v32 = vld [vmem:[%s3704_s1 + $0x40] sm:$0xff]  ;;  %v65_v33 = vld [vmem:[%s3703_s0 + $0x58] sm:$0xff] }
  0x1e   :  { %222 = vperm.xlu1 %2653, %v77_v26   ;;  %2601 = vmatprep.subr.bf16.mxu0 %v2600_v28  ;;  %v64_v34 = vld [vmem:[%s3703_s0 + $0x50] sm:$0xff]  ;;  %v81_v35 = vld [vmem:[%s3704_s1 + $0x58] sm:$0xff]  ;;  %v67_v37 = vld [vmem:[%s3703_s0 + $0x68] sm:$0xff]  ;;  %v3004_v17 = vand.u32 127, %v150_v14 }
  0x1f   :  { %219 = vperm.xlu0 %2652, %v76_v27   ;;  %2611 = vmatprep.subr.bf16.mxu1 %v2600_v28  ;;  %v80_v36 = vld [vmem:[%s3704_s1 + $0x50] sm:$0xff]  ;;  %v66_v38 = vld [vmem:[%s3703_s0 + $0x60] sm:$0xff]  ;;  %v83_v39 = vld [vmem:[%s3704_s1 + $0x68] sm:$0xff] }
  0x20   :  { %v82_v40 = vld [vmem:[%s3704_s1 + $0x60] sm:$0xff]  ;;  %v69_v41 = vld [vmem:[%s3703_s0 + $0x78] sm:$0xff]  ;;  %v68_v42 = vld [vmem:[%s3703_s0 + $0x70] sm:$0xff] }
  0x21   :  { %2603 = vmatpush3.bf16.msra.mxu0 %v2600_v28  ;;  %2615 = vmatpush3.bf16.msra.mxu1 %v2600_v28  ;;  %v85_v43 = vld [vmem:[%s3704_s1 + $0x78] sm:$0xff]  ;;  %v84_v44 = vld [vmem:[%s3704_s1 + $0x70] sm:$0xff]  ;;  %v1314_v45 = vld [vmem:[%s3710_s7] sm:$0xff] }
  0x22   :  { %180 = vperm.xlu1 %2653, %v63_v29   ;;  %v1315_v46 = vld [vmem:[%s3710_s7 + $0x8] sm:$0xff]  ;;  %v118_v48 = vld [vmem:[%s3705_s2] sm:$0xff]  ;;  %v121_v52 = vld [vmem:[%s3705_s2 + $0x18] sm:$0xff] }
  0x23   :  { %177 = vperm.xlu0 %2652, %v62_v30   ;;  %v119_v47 = vld [vmem:[%s3705_s2 + $0x8] sm:$0xff]  ;;  %v2910_v49 = vpack.c.bf16 %v1315_v46, %v1314_v45  ;;  %v86_v51 = vld [vmem:[%s3706_s3] sm:$0xff]  ;;  %v120_v53 = vld [vmem:[%s3705_s2 + $0x10] sm:$0xff] }
  0x24   :  { %v87_v50 = vld [vmem:[%s3706_s3 + $0x8] sm:$0xff]  ;;  %v89_v54 = vld [vmem:[%s3706_s3 + $0x18] sm:$0xff]  ;;  %v88_v55 = vld [vmem:[%s3706_s3 + $0x10] sm:$0xff] }
  0x25   :  { %2605 = vmatprep.subr.bf16.mxu0 %v2910_v49  ;;  %v123_v56 = vld [vmem:[%s3705_s2 + $0x28] sm:$0xff]  ;;  %v122_v57 = vld [vmem:[%s3705_s2 + $0x20] sm:$0xff]  ;;  %v125_v60 = vld [vmem:[%s3705_s2 + $0x38] sm:$0xff] }
  0x26   :  { %228 = vperm.xlu1 %2653, %v79_v31   ;;  %v91_v58 = vld [vmem:[%s3706_s3 + $0x28] sm:$0xff]  ;;  %v90_v59 = vld [vmem:[%s3706_s3 + $0x20] sm:$0xff]  ;;  %v124_v61 = vld [vmem:[%s3705_s2 + $0x30] sm:$0xff] }
  0x27   :  { %225 = vperm.xlu0 %2652, %v78_v32   ;;  %v93_v62 = vld [vmem:[%s3706_s3 + $0x38] sm:$0xff]  ;;  %v92_v63 = vld [vmem:[%s3706_s3 + $0x30] sm:$0xff]  ;;  %v127_v0 = vld [vmem:[%s3705_s2 + $0x48] sm:$0xff] }
  0x28   :  { %v126_v1 = vld [vmem:[%s3705_s2 + $0x40] sm:$0xff]  ;;  %v95_v2 = vld [vmem:[%s3706_s3 + $0x48] sm:$0xff]  ;;  %v129_v4 = vld [vmem:[%s3705_s2 + $0x58] sm:$0xff] }
  0x29   :  { %v94_v3 = vld [vmem:[%s3706_s3 + $0x40] sm:$0xff]  ;;  %v128_v5 = vld [vmem:[%s3705_s2 + $0x50] sm:$0xff]  ;;  %v97_v6 = vld [vmem:[%s3706_s3 + $0x58] sm:$0xff] }
  0x2a   :  { %186 = vperm.xlu1 %2653, %v65_v33   ;;  %v96_v7 = vld [vmem:[%s3706_s3 + $0x50] sm:$0xff]  ;;  %v131_v8 = vld [vmem:[%s3705_s2 + $0x68] sm:$0xff]  ;;  %v130_v9 = vld [vmem:[%s3705_s2 + $0x60] sm:$0xff] }
  0x2b   :  { %183 = vperm.xlu0 %2652, %v64_v34   ;;  %v99_v10 = vld [vmem:[%s3706_s3 + $0x68] sm:$0xff]  ;;  %v98_v11 = vld [vmem:[%s3706_s3 + $0x60] sm:$0xff]  ;;  %v133_v12 = vld [vmem:[%s3705_s2 + $0x78] sm:$0xff] }
  0x2c   :  { %v132_v13 = vld [vmem:[%s3705_s2 + $0x70] sm:$0xff]  ;;  %v101_v15 = vld [vmem:[%s3706_s3 + $0x78] sm:$0xff]  ;;  %v135_v18 = vld [vmem:[%s3708_s5 + $0x8] sm:$0xff] }
  0x2d   :  { %v100_v16 = vld [vmem:[%s3706_s3 + $0x70] sm:$0xff]  ;;  %v134_v19 = vld [vmem:[%s3708_s5] sm:$0xff]  ;;  %v103_v25 = vld [vmem:[%s3707_s4 + $0x8] sm:$0xff] }
  0x2e   :  { %234 = vperm.xlu1 %2653, %v81_v35   ;;  %v102_v26 = vld [vmem:[%s3707_s4] sm:$0xff]  ;;  %v137_v31 = vld [vmem:[%s3708_s5 + $0x18] sm:$0xff]  ;;  %v136_v32 = vld [vmem:[%s3708_s5 + $0x10] sm:$0xff] }
  0x2f   :  { %231 = vperm.xlu0 %2652, %v80_v36  }
  0x32   :  { %192 = vperm.xlu1 %2653, %v67_v37   ;;  %v105_v37 = vld [vmem:[%s3707_s4 + $0x18] sm:$0xff] }
  0x33   :  { %189 = vperm.xlu0 %2652, %v66_v38   ;;  %v104_v38 = vld [vmem:[%s3707_s4 + $0x10] sm:$0xff] }
  0x36   :  { %240 = vperm.xlu1 %2653, %v83_v39  }
  0x37   :  { %237 = vperm.xlu0 %2652, %v82_v40  }
  0x3a   :  { %198 = vperm.xlu1 %2653, %v69_v41  }
  0x3b   :  { %195 = vperm.xlu0 %2652, %v68_v42  }
  0x3e   :  { %246 = vperm.xlu1 %2653, %v85_v43   ;;  %v139_v43 = vld [vmem:[%s3708_s5 + $0x28] sm:$0xff] }
  0x3f   :  { %243 = vperm.xlu0 %2652, %v84_v44   ;;  %v138_v44 = vld [vmem:[%s3708_s5 + $0x20] sm:$0xff] }
  0x42   :  { %1126 = vperm.xlu1 %2653, %v119_v47  }
  0x43   :  { %1123 = vperm.xlu0 %2652, %v118_v48  }
  0x46   :  { %252 = vperm.xlu1 %2653, %v87_v50   ;;  %v106_v50 = vld [vmem:[%s3707_s4 + $0x20] sm:$0xff] }
  0x47   :  { %249 = vperm.xlu0 %2652, %v86_v51  }
  0x4a   :  { %1132 = vperm.xlu1 %2653, %v121_v52  }
  0x4b   :  { %1129 = vperm.xlu0 %2652, %v120_v53  }
  0x4e   :  { %258 = vperm.xlu1 %2653, %v89_v54  }
  0x4f   :  { %255 = vperm.xlu0 %2652, %v88_v55   ;;  %v141_v55 = vld [vmem:[%s3708_s5 + $0x38] sm:$0xff] }
  0x52   :  { %1138 = vperm.xlu1 %2653, %v123_v56   ;;  %v140_v56 = vld [vmem:[%s3708_s5 + $0x30] sm:$0xff] }
  0x53   :  { %1135 = vperm.xlu0 %2652, %v122_v57  }
  0x56   :  { %264 = vperm.xlu1 %2653, %v91_v58  }
  0x57   :  { %261 = vperm.xlu0 %2652, %v90_v59  }
  0x5a   :  { %1144 = vperm.xlu1 %2653, %v125_v60  }
  0x5b   :  { %1141 = vperm.xlu0 %2652, %v124_v61   ;;  %v109_v61 = vld [vmem:[%s3707_s4 + $0x38] sm:$0xff] }
  0x5e   :  { %270 = vperm.xlu1 %2653, %v93_v62   ;;  %v108_v62 = vld [vmem:[%s3707_s4 + $0x30] sm:$0xff] }
  0x5f   :  { %267 = vperm.xlu0 %2652, %v92_v63  }
  0x62   :  { %1150 = vperm.xlu1 %2653, %v127_v0  }
  0x63   :  { %1147 = vperm.xlu0 %2652, %v126_v1  }
  0x66   :  { %276 = vperm.xlu1 %2653, %v95_v2  }
  0x67   :  { %273 = vperm.xlu0 %2652, %v94_v3   ;;  %v143_v3 = vld [vmem:[%s3708_s5 + $0x48] sm:$0xff] }
  0x6a   :  { %1156 = vperm.xlu1 %2653, %v129_v4   ;;  %v142_v4 = vld [vmem:[%s3708_s5 + $0x40] sm:$0xff] }
  0x6b   :  { %1153 = vperm.xlu0 %2652, %v128_v5  }
  0x6e   :  { %282 = vperm.xlu1 %2653, %v97_v6  }
  0x6f   :  { %279 = vperm.xlu0 %2652, %v96_v7  }
  0x72   :  { %1162 = vperm.xlu1 %2653, %v131_v8  }
  0x73   :  { %1159 = vperm.xlu0 %2652, %v130_v9   ;;  %v111_v9 = vld [vmem:[%s3707_s4 + $0x48] sm:$0xff] }
  0x76   :  { %288 = vperm.xlu1 %2653, %v99_v10   ;;  %v110_v10 = vld [vmem:[%s3707_s4 + $0x40] sm:$0xff] }
  0x77   :  { %285 = vperm.xlu0 %2652, %v98_v11  }
  0x7a   :  { %1168 = vperm.xlu1 %2653, %v133_v12  }
  0x7b   :  { %1165 = vperm.xlu0 %2652, %v132_v13  }
  0x7e   :  { %294 = vperm.xlu1 %2653, %v101_v15  }
  0x7f   :  { %291 = vperm.xlu0 %2652, %v100_v16   ;;  %v145_v16 = vld [vmem:[%s3708_s5 + $0x58] sm:$0xff] }
  0x81   :  { %v202_v20 = vpop.permute.xlu1 %201 }
  0x82   :  { %v154_v21 = vpop.permute.xlu0 %153  ;;  %1174 = vperm.xlu1 %2653, %v135_v18   ;;  %vm360_vm2 = vcmp.eq.s32.totalorder %v3004_v17, %v202_v20  ;;  %v144_v18 = vld [vmem:[%s3708_s5 + $0x50] sm:$0xff] }
  0x83   :  { %1171 = vperm.xlu0 %2652, %v134_v19   ;;  %vm344_vm1 = vcmp.eq.s32.totalorder %v3004_v17, %v154_v21  ;;  %v2142_v24 = vsel %vm360_vm2, 1.0, %v2705_v22 }
  0x84   :  { %v2126_v23 = vsel %vm344_vm1, 1.0, %v2705_v22  ;;  %2464 = vmatprep.mubr.msk.f32.mxu1 %vm544_vm0, %v2142_v24  ;;  %v113_v24 = vld [vmem:[%s3707_s4 + $0x58] sm:$0xff] }
  0x85   :  { %2440 = vmatprep.mubr.msk.f32.mxu0 %vm544_vm0, %v2126_v23  ;;  %v205_v27 = vpop.permute.xlu1 %204 }
  0x86   :  { %v157_v28 = vpop.permute.xlu0 %156  ;;  %vm361_vm3 = vcmp.eq.s32.totalorder %v3004_v17, %v205_v27  ;;  %300 = vperm.xlu1 %2653, %v103_v25   ;;  %v112_v25 = vld [vmem:[%s3707_s4 + $0x50] sm:$0xff] }
  0x87   :  { %vm345_vm4 = vcmp.eq.s32.totalorder %v3004_v17, %v157_v28  ;;  %297 = vperm.xlu0 %2652, %v102_v26   ;;  %v2143_v29 = vsel %vm361_vm3, 1.0, %v2705_v22 }
  0x88   :  { %v2127_v30 = vsel %vm345_vm4, 1.0, %v2705_v22  ;;  %2465 = vmatmul.mubr.msk.f32.vlgmr.msra.gmra.mrb[0].mxu1 %vm544_vm0, %v2143_v29 }
  0x89   :  { %2441 = vmatmul.mubr.msk.f32.vlgmr.msra.gmra.mrb[0].mxu0 %vm544_vm0, %v2127_v30  ;;  %v163_v33 = vpop.permute.xlu1 %162  ;;  %v147_v30 = vld [vmem:[%s3708_s5 + $0x68] sm:$0xff] }
  0x8a   :  { %v160_v34 = vpop.permute.xlu0 %159  ;;  %2607 = vmatpush3.bf16.msra.mxu0 %v2910_v49  ;;  %vm347_vm5 = vcmp.eq.s32.totalorder %v3004_v17, %v163_v33  ;;  %1180 = vperm.xlu1 %2653, %v137_v31   ;;  %v107_v49 = vld [vmem:[%s3707_s4 + $0x28] sm:$0xff]  ;;  %v146_v31 = vld [vmem:[%s3708_s5 + $0x60] sm:$0xff] }
  0x8b   :  { %vm346_vm6 = vcmp.eq.s32.totalorder %v3004_v17, %v160_v34  ;;  %1177 = vperm.xlu0 %2652, %v136_v32   ;;  %v2129_v35 = vsel %vm347_vm5, 1.0, %v2705_v22 }
  0x8c   :  { %v2128_v36 = vsel %vm346_vm6, 1.0, %v2705_v22 }
  0x8d   :  { %2443 = vmatprep.mubr.msk.f32.mxu0 %vm544_vm0, %v2128_v36  ;;  %v211_v39 = vpop.permute.xlu1 %210  ;;  %v115_v36 = vld [vmem:[%s3707_s4 + $0x68] sm:$0xff] }
  0x8e   :  { %2444 = vmatmul.mubr.msk.f32.gmra.mrb[2].mxu0 %vm544_vm0, %v2129_v35  ;;  %v208_v40 = vpop.permute.xlu0 %207  ;;  %vm363_vm7 = vcmp.eq.s32.totalorder %v3004_v17, %v211_v39  ;;  %306 = vperm.xlu1 %2653, %v105_v37   ;;  %v114_v37 = vld [vmem:[%s3707_s4 + $0x60] sm:$0xff] }
  0x8f   :  { %vm362_vm8 = vcmp.eq.s32.totalorder %v3004_v17, %v208_v40  ;;  %303 = vperm.xlu0 %2652, %v104_v38   ;;  %v2145_v41 = vsel %vm363_vm7, 1.0, %v2705_v22 }
  0x90   :  { %v2144_v42 = vsel %vm362_vm8, 1.0, %v2705_v22 }
  0x91   :  { %2467 = vmatprep.mubr.msk.f32.mxu1 %vm544_vm0, %v2144_v42  ;;  %v169_v45 = vpop.permute.xlu1 %168  ;;  %v149_v42 = vld [vmem:[%s3708_s5 + $0x78] sm:$0xff] }
  0x92   :  { %2468 = vmatmul.mubr.msk.f32.gmra.mrb[2].mxu1 %vm544_vm0, %v2145_v41  ;;  %v166_v46 = vpop.permute.xlu0 %165  ;;  %vm349_vm9 = vcmp.eq.s32.totalorder %v3004_v17, %v169_v45  ;;  %1186 = vperm.xlu1 %2653, %v139_v43   ;;  %v148_v43 = vld [vmem:[%s3708_s5 + $0x70] sm:$0xff] }
  0x93   :  { %vm348_vm10 = vcmp.eq.s32.totalorder %v3004_v17, %v166_v46  ;;  %1183 = vperm.xlu0 %2652, %v138_v44   ;;  %v2131_v47 = vsel %vm349_vm9, 1.0, %v2705_v22 }
  0x94   :  { %v2130_v48 = vsel %vm348_vm10, 1.0, %v2705_v22 }
  0x95   :  { %2446 = vmatprep.mubr.msk.f32.mxu0 %vm544_vm0, %v2130_v48  ;;  %v217_v51 = vpop.permute.xlu1 %216  ;;  %v117_v48 = vld [vmem:[%s3707_s4 + $0x78] sm:$0xff] }
  0x96   :  { %2447 = vmatmul.mubr.msk.f32.gmra.mrb[4].mxu0 %vm544_vm0, %v2131_v47  ;;  %v214_v52 = vpop.permute.xlu0 %213  ;;  %vm365_vm11 = vcmp.eq.s32.totalorder %v3004_v17, %v217_v51  ;;  %312 = vperm.xlu1 %2653, %v107_v49   ;;  %v116_v49 = vld [vmem:[%s3707_s4 + $0x70] sm:$0xff] }
  0x97   :  { %vm364_vm12 = vcmp.eq.s32.totalorder %v3004_v17, %v214_v52  ;;  %309 = vperm.xlu0 %2652, %v106_v50   ;;  %v2147_v53 = vsel %vm365_vm11, 1.0, %v2705_v22 }
  0x98   :  { %v2146_v54 = vsel %vm364_vm12, 1.0, %v2705_v22 }
  0x99   :  { %2470 = vmatprep.mubr.msk.f32.mxu1 %vm544_vm0, %v2146_v54  ;;  %v175_v57 = vpop.permute.xlu1 %174 }
  0x9a   :  { %2471 = vmatmul.mubr.msk.f32.gmra.mrb[4].mxu1 %vm544_vm0, %v2147_v53  ;;  %v172_v58 = vpop.permute.xlu0 %171  ;;  %vm351_vm13 = vcmp.eq.s32.totalorder %v3004_v17, %v175_v57  ;;  %1192 = vperm.xlu1 %2653, %v141_v55  }
  0x9b   :  { %vm350_vm14 = vcmp.eq.s32.totalorder %v3004_v17, %v172_v58  ;;  %1189 = vperm.xlu0 %2652, %v140_v56   ;;  %v2133_v59 = vsel %vm351_vm13, 1.0, %v2705_v22 }
  0x9c   :  { %v2132_v60 = vsel %vm350_vm14, 1.0, %v2705_v22 }
  0x9d   :  { %2449 = vmatprep.mubr.msk.f32.mxu0 %vm544_vm0, %v2132_v60  ;;  %v223_v63 = vpop.permute.xlu1 %222 }
  0x9e   :  { %2450 = vmatmul.mubr.msk.f32.gmra.mrb[6].mxu0 %vm544_vm0, %v2133_v59  ;;  %v220_v0 = vpop.permute.xlu0 %219  ;;  %vm367_vm15 = vcmp.eq.s32.totalorder %v3004_v17, %v223_v63  ;;  %318 = vperm.xlu1 %2653, %v109_v61  }
  0x9f   :  { %vm366_vm1 = vcmp.eq.s32.totalorder %v3004_v17, %v220_v0  ;;  %315 = vperm.xlu0 %2652, %v108_v62   ;;  %v2149_v1 = vsel %vm367_vm15, 1.0, %v2705_v22 }
  0xa0   :  { %v2148_v2 = vsel %vm366_vm1, 1.0, %v2705_v22 }
  0xa1   :  { %2473 = vmatprep.mubr.msk.f32.mxu1 %vm544_vm0, %v2148_v2  ;;  %v181_v5 = vpop.permute.xlu1 %180 }
  0xa2   :  { %2474 = vmatmul.mubr.msk.f32.gmra.mrb[6].mxu1 %vm544_vm0, %v2149_v1  ;;  %v178_v6 = vpop.permute.xlu0 %177  ;;  %vm353_vm2 = vcmp.eq.s32.totalorder %v3004_v17, %v181_v5  ;;  %1198 = vperm.xlu1 %2653, %v143_v3  }
  0xa3   :  { %vm352_vm3 = vcmp.eq.s32.totalorder %v3004_v17, %v178_v6  ;;  %1195 = vperm.xlu0 %2652, %v142_v4   ;;  %v2135_v7 = vsel %vm353_vm2, 1.0, %v2705_v22 }
  0xa4   :  { %v2134_v8 = vsel %vm352_vm3, 1.0, %v2705_v22  ;;  %vm1316_vm3 = vcmask 130048  }
  0xa5   :  { %2452 = vmatprep.mubr.msk.f32.mxu0 %vm544_vm0, %v2134_v8  ;;  %v229_v11 = vpop.permute.xlu1 %228 }
  0xa6   :  { %2453 = vmatmul.mubr.msk.f32.gmra.mrb[8].mxu0 %vm544_vm0, %v2135_v7  ;;  %v226_v12 = vpop.permute.xlu0 %225  ;;  %vm369_vm4 = vcmp.eq.s32.totalorder %v3004_v17, %v229_v11  ;;  %324 = vperm.xlu1 %2653, %v111_v9  }
  0xa7   :  { %vm368_vm5 = vcmp.eq.s32.totalorder %v3004_v17, %v226_v12  ;;  %321 = vperm.xlu0 %2652, %v110_v10   ;;  %v2151_v13 = vsel %vm369_vm4, 1.0, %v2705_v22 }
  0xa8   :  { %v2150_v15 = vsel %vm368_vm5, 1.0, %v2705_v22 }
  0xa9   :  { %2476 = vmatprep.mubr.msk.f32.mxu1 %vm544_vm0, %v2150_v15  ;;  %v187_v19 = vpop.permute.xlu1 %186 }
  0xaa   :  { %2477 = vmatmul.mubr.msk.f32.gmra.mrb[8].mxu1 %vm544_vm0, %v2151_v13  ;;  %v184_v20 = vpop.permute.xlu0 %183  ;;  %vm355_vm6 = vcmp.eq.s32.totalorder %v3004_v17, %v187_v19  ;;  %1204 = vperm.xlu1 %2653, %v145_v16  }
  0xab   :  { %vm354_vm7 = vcmp.eq.s32.totalorder %v3004_v17, %v184_v20  ;;  %1201 = vperm.xlu0 %2652, %v144_v18   ;;  %v2137_v21 = vsel %vm355_vm6, 1.0, %v2705_v22 }
  0xac   :  { %v2136_v23 = vsel %vm354_vm7, 1.0, %v2705_v22 }
  0xad   :  { %2455 = vmatprep.mubr.msk.f32.mxu0 %vm544_vm0, %v2136_v23  ;;  %v235_v26 = vpop.permute.xlu1 %234 }
  0xae   :  { %2456 = vmatmul.mubr.msk.f32.gmra.mrb[10].mxu0 %vm544_vm0, %v2137_v21  ;;  %v232_v27 = vpop.permute.xlu0 %231  ;;  %vm371_vm8 = vcmp.eq.s32.totalorder %v3004_v17, %v235_v26  ;;  %330 = vperm.xlu1 %2653, %v113_v24  }
  0xaf   :  { %vm370_vm9 = vcmp.eq.s32.totalorder %v3004_v17, %v232_v27  ;;  %327 = vperm.xlu0 %2652, %v112_v25   ;;  %v2153_v28 = vsel %vm371_vm8, 1.0, %v2705_v22 }
  0xb0   :  { %v2152_v29 = vsel %vm370_vm9, 1.0, %v2705_v22 }
  0xb1   :  { %2479 = vmatprep.mubr.msk.f32.mxu1 %vm544_vm0, %v2152_v29  ;;  %v193_v32 = vpop.permute.xlu1 %192 }
  0xb2   :  { %2480 = vmatmul.mubr.msk.f32.gmra.mrb[10].mxu1 %vm544_vm0, %v2153_v28  ;;  %v190_v33 = vpop.permute.xlu0 %189  ;;  %vm357_vm10 = vcmp.eq.s32.totalorder %v3004_v17, %v193_v32  ;;  %1210 = vperm.xlu1 %2653, %v147_v30  }
  0xb3   :  { %vm356_vm11 = vcmp.eq.s32.totalorder %v3004_v17, %v190_v33  ;;  %1207 = vperm.xlu0 %2652, %v146_v31   ;;  %v2139_v34 = vsel %vm357_vm10, 1.0, %v2705_v22 }
  0xb4   :  { %v2138_v35 = vsel %vm356_vm11, 1.0, %v2705_v22 }
  0xb5   :  { %2458 = vmatprep.mubr.msk.f32.mxu0 %vm544_vm0, %v2138_v35  ;;  %v241_v38 = vpop.permute.xlu1 %240 }
  0xb6   :  { %2459 = vmatmul.mubr.msk.f32.gmra.mrb[12].mxu0 %vm544_vm0, %v2139_v34  ;;  %v238_v39 = vpop.permute.xlu0 %237  ;;  %vm373_vm12 = vcmp.eq.s32.totalorder %v3004_v17, %v241_v38  ;;  %336 = vperm.xlu1 %2653, %v115_v36  }
  0xb7   :  { %vm372_vm13 = vcmp.eq.s32.totalorder %v3004_v17, %v238_v39  ;;  %333 = vperm.xlu0 %2652, %v114_v37   ;;  %v2155_v40 = vsel %vm373_vm12, 1.0, %v2705_v22 }
  0xb8   :  { %v2154_v41 = vsel %vm372_vm13, 1.0, %v2705_v22 }
  0xb9   :  { %2482 = vmatprep.mubr.msk.f32.mxu1 %vm544_vm0, %v2154_v41  ;;  %v199_v44 = vpop.permute.xlu1 %198 }
  0xba   :  { %2483 = vmatmul.mubr.msk.f32.gmra.mrb[12].mxu1 %vm544_vm0, %v2155_v40  ;;  %v196_v45 = vpop.permute.xlu0 %195  ;;  %vm359_vm14 = vcmp.eq.s32.totalorder %v3004_v17, %v199_v44  ;;  %1216 = vperm.xlu1 %2653, %v149_v42  }
  0xbb   :  { %vm358_vm15 = vcmp.eq.s32.totalorder %v3004_v17, %v196_v45  ;;  %1213 = vperm.xlu0 %2652, %v148_v43   ;;  %v2141_v46 = vsel %vm359_vm14, 1.0, %v2705_v22 }
  0xbc   :  { %v2140_v47 = vsel %vm358_vm15, 1.0, %v2705_v22 }
  0xbd   :  { %2461 = vmatprep.mubr.msk.f32.mxu0 %vm544_vm0, %v2140_v47  ;;  %v247_v50 = vpop.permute.xlu1 %246 }
  0xbe   :  { %2462 = vmatmul.mubr.msk.f32.gmra.mrb[14].mxu0 %vm544_vm0, %v2141_v46  ;;  %v244_v51 = vpop.permute.xlu0 %243  ;;  %vm375_vm1 = vcmp.eq.s32.totalorder %v3004_v17, %v247_v50  ;;  %342 = vperm.xlu1 %2653, %v117_v48  }
  0xbf   :  { %vm374_vm2 = vcmp.eq.s32.totalorder %v3004_v17, %v244_v51  ;;  %339 = vperm.xlu0 %2652, %v116_v49   ;;  %v2157_v52 = vsel %vm375_vm1, 1.0, %v2705_v22 }
  0xc0   :  { %v2156_v53 = vsel %vm374_vm2, 1.0, %v2705_v22 }
  0xc1   :  { %2485 = vmatprep.mubr.msk.f32.mxu1 %vm544_vm0, %v2156_v53  ;;  %v1127_v54 = vpop.permute.xlu1 %1126 }
  0xc2   :  { %2486 = vmatmul.mubr.msk.f32.gmra.mrb[14].mxu1 %vm544_vm0, %v2157_v52  ;;  %v1124_v55 = vpop.permute.xlu0 %1123  ;;  %vm1219_vm4 = vcmp.eq.s32.totalorder %v3004_v17, %v1127_v54 }
  0xc3   :  { %vm1218_vm5 = vcmp.eq.s32.totalorder %v3004_v17, %v1124_v55  ;;  %v2255_v56 = vsel %vm1219_vm4, 1.0, %v2705_v22 }
  0xc4   :  { %v2254_v57 = vsel %vm1218_vm5, 1.0, %v2705_v22 }
  0xc5   :  { %2540 = vmatprep.mubr.msk.f32.mxu0 %vm1316_vm3, %v2254_v57  ;;  %v253_v58 = vpop.permute.xlu1 %252 }
  0xc6   :  { %2541 = vmatmul.mubr.msk.f32.vlgmr.msra.gmra.mrb[0].mxu0 %vm1316_vm3, %v2255_v56  ;;  %v250_v59 = vpop.permute.xlu0 %249  ;;  %vm377_vm6 = vcmp.eq.s32.totalorder %v3004_v17, %v253_v58 }
  0xc7   :  { %vm376_vm7 = vcmp.eq.s32.totalorder %v3004_v17, %v250_v59  ;;  %v2159_v60 = vsel %vm377_vm6, 1.0, %v2705_v22 }
  0xc8   :  { %v2158_v61 = vsel %vm376_vm7, 1.0, %v2705_v22 }
  0xc9   :  { %2488 = vmatprep.mubr.msk.f32.mxu1 %vm544_vm0, %v2158_v61  ;;  %v1133_v62 = vpop.permute.xlu1 %1132 }
  0xca   :  { %2489 = vmatmul.mubr.msk.f32.gmra.mrb[16].mxu1 %vm544_vm0, %v2159_v60  ;;  %v1130_v63 = vpop.permute.xlu0 %1129  ;;  %vm1221_vm8 = vcmp.eq.s32.totalorder %v3004_v17, %v1133_v62 }
  0xcb   :  { %vm1220_vm9 = vcmp.eq.s32.totalorder %v3004_v17, %v1130_v63  ;;  %v2257_v0 = vsel %vm1221_vm8, 1.0, %v2705_v22 }
  0xcc   :  { %v2256_v1 = vsel %vm1220_vm9, 1.0, %v2705_v22 }
  0xcd   :  { %2543 = vmatprep.mubr.msk.f32.mxu0 %vm1316_vm3, %v2256_v1  ;;  %v259_v2 = vpop.permute.xlu1 %258 }
  0xce   :  { %2544 = vmatmul.mubr.msk.f32.gmra.mrb[2].mxu0 %vm1316_vm3, %v2257_v0  ;;  %v256_v3 = vpop.permute.xlu0 %255  ;;  %vm379_vm10 = vcmp.eq.s32.totalorder %v3004_v17, %v259_v2 }
  0xcf   :  { %vm378_vm11 = vcmp.eq.s32.totalorder %v3004_v17, %v256_v3  ;;  %v2161_v4 = vsel %vm379_vm10, 1.0, %v2705_v22 }
  0xd0   :  { %v2160_v5 = vsel %vm378_vm11, 1.0, %v2705_v22 }
  0xd1   :  { %2491 = vmatprep.mubr.msk.f32.mxu1 %vm544_vm0, %v2160_v5  ;;  %v1139_v6 = vpop.permute.xlu1 %1138 }
  0xd2   :  { %2492 = vmatmul.mubr.msk.f32.gmra.mrb[18].mxu1 %vm544_vm0, %v2161_v4  ;;  %v1136_v7 = vpop.permute.xlu0 %1135  ;;  %vm1223_vm12 = vcmp.eq.s32.totalorder %v3004_v17, %v1139_v6 }
  0xd3   :  { %vm1222_vm13 = vcmp.eq.s32.totalorder %v3004_v17, %v1136_v7  ;;  %v2259_v8 = vsel %vm1223_vm12, 1.0, %v2705_v22 }
  0xd4   :  { %v2258_v9 = vsel %vm1222_vm13, 1.0, %v2705_v22 }
  0xd5   :  { %2546 = vmatprep.mubr.msk.f32.mxu0 %vm1316_vm3, %v2258_v9  ;;  %v265_v10 = vpop.permute.xlu1 %264 }
  0xd6   :  { %2547 = vmatmul.mubr.msk.f32.gmra.mrb[4].mxu0 %vm1316_vm3, %v2259_v8  ;;  %v262_v11 = vpop.permute.xlu0 %261  ;;  %vm381_vm14 = vcmp.eq.s32.totalorder %v3004_v17, %v265_v10 }
  0xd7   :  { %vm380_vm15 = vcmp.eq.s32.totalorder %v3004_v17, %v262_v11  ;;  %v2163_v12 = vsel %vm381_vm14, 1.0, %v2705_v22 }
  0xd8   :  { %v2162_v13 = vsel %vm380_vm15, 1.0, %v2705_v22 }
  0xd9   :  { %2494 = vmatprep.mubr.msk.f32.mxu1 %vm544_vm0, %v2162_v13  ;;  %v1145_v15 = vpop.permute.xlu1 %1144 }
  0xda   :  { %2495 = vmatmul.mubr.msk.f32.gmra.mrb[20].mxu1 %vm544_vm0, %v2163_v12  ;;  %v1142_v16 = vpop.permute.xlu0 %1141  ;;  %vm1225_vm1 = vcmp.eq.s32.totalorder %v3004_v17, %v1145_v15 }
  0xdb   :  { %vm1224_vm2 = vcmp.eq.s32.totalorder %v3004_v17, %v1142_v16  ;;  %v2261_v18 = vsel %vm1225_vm1, 1.0, %v2705_v22 }
  0xdc   :  { %v2260_v19 = vsel %vm1224_vm2, 1.0, %v2705_v22 }
  0xdd   :  { %2549 = vmatprep.mubr.msk.f32.mxu0 %vm1316_vm3, %v2260_v19  ;;  %v271_v20 = vpop.permute.xlu1 %270 }
  0xde   :  { %2550 = vmatmul.mubr.msk.f32.gmra.mrb[6].mxu0 %vm1316_vm3, %v2261_v18  ;;  %v268_v21 = vpop.permute.xlu0 %267  ;;  %vm383_vm4 = vcmp.eq.s32.totalorder %v3004_v17, %v271_v20 }
  0xdf   :  { %vm382_vm5 = vcmp.eq.s32.totalorder %v3004_v17, %v268_v21  ;;  %v2165_v23 = vsel %vm383_vm4, 1.0, %v2705_v22 }
  0xe0   :  { %v2164_v24 = vsel %vm382_vm5, 1.0, %v2705_v22 }
  0xe1   :  { %2497 = vmatprep.mubr.msk.f32.mxu1 %vm544_vm0, %v2164_v24  ;;  %v1151_v25 = vpop.permute.xlu1 %1150 }
  0xe2   :  { %2498 = vmatmul.mubr.msk.f32.gmra.mrb[22].mxu1 %vm544_vm0, %v2165_v23  ;;  %v1148_v26 = vpop.permute.xlu0 %1147  ;;  %vm1227_vm6 = vcmp.eq.s32.totalorder %v3004_v17, %v1151_v25 }
  0xe3   :  { %vm1226_vm7 = vcmp.eq.s32.totalorder %v3004_v17, %v1148_v26  ;;  %v2263_v27 = vsel %vm1227_vm6, 1.0, %v2705_v22 }
  0xe4   :  { %v2262_v28 = vsel %vm1226_vm7, 1.0, %v2705_v22 }
  0xe5   :  { %2552 = vmatprep.mubr.msk.f32.mxu0 %vm1316_vm3, %v2262_v28  ;;  %v277_v29 = vpop.permute.xlu1 %276 }
  0xe6   :  { %2553 = vmatmul.mubr.msk.f32.gmra.mrb[8].mxu0 %vm1316_vm3, %v2263_v27  ;;  %v274_v30 = vpop.permute.xlu0 %273  ;;  %vm385_vm8 = vcmp.eq.s32.totalorder %v3004_v17, %v277_v29 }
  0xe7   :  { %vm384_vm9 = vcmp.eq.s32.totalorder %v3004_v17, %v274_v30  ;;  %v2167_v31 = vsel %vm385_vm8, 1.0, %v2705_v22 }
  0xe8   :  { %v2166_v32 = vsel %vm384_vm9, 1.0, %v2705_v22 }
  0xe9   :  { %2500 = vmatprep.mubr.msk.f32.mxu1 %vm544_vm0, %v2166_v32  ;;  %v1157_v33 = vpop.permute.xlu1 %1156 }
  0xea   :  { %2501 = vmatmul.mubr.msk.f32.gmra.mrb[24].mxu1 %vm544_vm0, %v2167_v31  ;;  %v1154_v34 = vpop.permute.xlu0 %1153  ;;  %vm1229_vm10 = vcmp.eq.s32.totalorder %v3004_v17, %v1157_v33 }
  0xeb   :  { %vm1228_vm11 = vcmp.eq.s32.totalorder %v3004_v17, %v1154_v34  ;;  %v2265_v35 = vsel %vm1229_vm10, 1.0, %v2705_v22 }
  0xec   :  { %v2264_v36 = vsel %vm1228_vm11, 1.0, %v2705_v22 }
  0xed   :  { %2555 = vmatprep.mubr.msk.f32.mxu0 %vm1316_vm3, %v2264_v36  ;;  %v283_v37 = vpop.permute.xlu1 %282 }
  0xee   :  { %2556 = vmatmul.mubr.msk.f32.gmra.mrb[10].mxu0 %vm1316_vm3, %v2265_v35  ;;  %v280_v38 = vpop.permute.xlu0 %279  ;;  %vm387_vm12 = vcmp.eq.s32.totalorder %v3004_v17, %v283_v37 }
  0xef   :  { %vm386_vm13 = vcmp.eq.s32.totalorder %v3004_v17, %v280_v38  ;;  %v2169_v39 = vsel %vm387_vm12, 1.0, %v2705_v22 }
  0xf0   :  { %v2168_v40 = vsel %vm386_vm13, 1.0, %v2705_v22 }
  0xf1   :  { %2503 = vmatprep.mubr.msk.f32.mxu1 %vm544_vm0, %v2168_v40  ;;  %v1163_v41 = vpop.permute.xlu1 %1162 }
  0xf2   :  { %2504 = vmatmul.mubr.msk.f32.gmra.mrb[26].mxu1 %vm544_vm0, %v2169_v39  ;;  %v1160_v42 = vpop.permute.xlu0 %1159  ;;  %vm1231_vm14 = vcmp.eq.s32.totalorder %v3004_v17, %v1163_v41 }
  0xf3   :  { %vm1230_vm15 = vcmp.eq.s32.totalorder %v3004_v17, %v1160_v42  ;;  %v2267_v43 = vsel %vm1231_vm14, 1.0, %v2705_v22 }
  0xf4   :  { %v2266_v44 = vsel %vm1230_vm15, 1.0, %v2705_v22 }
  0xf5   :  { %2558 = vmatprep.mubr.msk.f32.mxu0 %vm1316_vm3, %v2266_v44  ;;  %v289_v45 = vpop.permute.xlu1 %288 }
  0xf6   :  { %2559 = vmatmul.mubr.msk.f32.gmra.mrb[12].mxu0 %vm1316_vm3, %v2267_v43  ;;  %v286_v46 = vpop.permute.xlu0 %285  ;;  %vm389_vm1 = vcmp.eq.s32.totalorder %v3004_v17, %v289_v45 }
  0xf7   :  { %vm388_vm2 = vcmp.eq.s32.totalorder %v3004_v17, %v286_v46  ;;  %v2171_v47 = vsel %vm389_vm1, 1.0, %v2705_v22 }
  0xf8   :  { %v2170_v48 = vsel %vm388_vm2, 1.0, %v2705_v22 }
  0xf9   :  { %2506 = vmatprep.mubr.msk.f32.mxu1 %vm544_vm0, %v2170_v48  ;;  %v1169_v49 = vpop.permute.xlu1 %1168 }
  0xfa   :  { %2507 = vmatmul.mubr.msk.f32.gmra.mrb[28].mxu1 %vm544_vm0, %v2171_v47  ;;  %v1166_v50 = vpop.permute.xlu0 %1165  ;;  %vm1233_vm4 = vcmp.eq.s32.totalorder %v3004_v17, %v1169_v49 }
  0xfb   :  { %vm1232_vm5 = vcmp.eq.s32.totalorder %v3004_v17, %v1166_v50  ;;  %v2269_v51 = vsel %vm1233_vm4, 1.0, %v2705_v22 }
  0xfc   :  { %v2268_v52 = vsel %vm1232_vm5, 1.0, %v2705_v22 }
  0xfd   :  { %2561 = vmatprep.mubr.msk.f32.mxu0 %vm1316_vm3, %v2268_v52  ;;  %v295_v53 = vpop.permute.xlu1 %294 }
  0xfe   :  { %2562 = vmatmul.mubr.msk.f32.gmra.mrb[14].mxu0 %vm1316_vm3, %v2269_v51  ;;  %v292_v54 = vpop.permute.xlu0 %291  ;;  %vm391_vm6 = vcmp.eq.s32.totalorder %v3004_v17, %v295_v53 }
  0xff   :  { %vm390_vm7 = vcmp.eq.s32.totalorder %v3004_v17, %v292_v54  ;;  %v2173_v55 = vsel %vm391_vm6, 1.0, %v2705_v22 }
 0x100   :  { %v2172_v56 = vsel %vm390_vm7, 1.0, %v2705_v22 }
 0x101   :  { %2509 = vmatprep.mubr.msk.f32.mxu1 %vm544_vm0, %v2172_v56  ;;  %v1175_v57 = vpop.permute.xlu1 %1174 }
 0x102   :  { %2510 = vmatmul.mubr.msk.f32.gmra.mrb[30].mxu1 %vm544_vm0, %v2173_v55  ;;  %v1172_v58 = vpop.permute.xlu0 %1171  ;;  %vm1235_vm8 = vcmp.eq.s32.totalorder %v3004_v17, %v1175_v57 }
 0x103   :  { %vm1234_vm9 = vcmp.eq.s32.totalorder %v3004_v17, %v1172_v58  ;;  %v2271_v59 = vsel %vm1235_vm8, 1.0, %v2705_v22 }
 0x104   :  { %v2270_v60 = vsel %vm1234_vm9, 1.0, %v2705_v22 }
 0x105   :  { %2564 = vmatprep.mubr.msk.f32.mxu0 %vm1316_vm3, %v2270_v60  ;;  %v301_v61 = vpop.permute.xlu1 %300 }
 0x106   :  { %2565 = vmatmul.mubr.msk.f32.gmra.mrb[16].mxu0 %vm1316_vm3, %v2271_v59  ;;  %v298_v62 = vpop.permute.xlu0 %297  ;;  %vm393_vm10 = vcmp.eq.s32.totalorder %v3004_v17, %v301_v61 }
 0x107   :  { %vm392_vm11 = vcmp.eq.s32.totalorder %v3004_v17, %v298_v62  ;;  %v2175_v63 = vsel %vm393_vm10, 1.0, %v2705_v22 }
 0x108   :  { %v2174_v0 = vsel %vm392_vm11, 1.0, %v2705_v22 }
 0x109   :  { %2512 = vmatprep.mubr.msk.f32.mxu1 %vm544_vm0, %v2174_v0  ;;  %v1181_v1 = vpop.permute.xlu1 %1180 }
 0x10a   :  { %2513 = vmatmul.mubr.msk.f32.gmra.mrb[32].mxu1 %vm544_vm0, %v2175_v63  ;;  %v1178_v2 = vpop.permute.xlu0 %1177  ;;  %vm1237_vm12 = vcmp.eq.s32.totalorder %v3004_v17, %v1181_v1 }
 0x10b   :  { %vm1236_vm13 = vcmp.eq.s32.totalorder %v3004_v17, %v1178_v2  ;;  %v2273_v3 = vsel %vm1237_vm12, 1.0, %v2705_v22 }
 0x10c   :  { %v2272_v4 = vsel %vm1236_vm13, 1.0, %v2705_v22 }
 0x10d   :  { %2567 = vmatprep.mubr.msk.f32.mxu0 %vm1316_vm3, %v2272_v4  ;;  %v307_v5 = vpop.permute.xlu1 %306  ;;  %v46_v4 = vld [vmem:[%s3714_s11] sm:$0x1] }
 0x10e   :  { %2568 = vmatmul.mubr.msk.f32.gmra.mrb[18].mxu0 %vm1316_vm3, %v2273_v3  ;;  %v304_v6 = vpop.permute.xlu0 %303  ;;  %vm395_vm14 = vcmp.eq.s32.totalorder %v3004_v17, %v307_v5 }
 0x10f   :  { %vm394_vm15 = vcmp.eq.s32.totalorder %v3004_v17, %v304_v6  ;;  %v2177_v7 = vsel %vm395_vm14, 1.0, %v2705_v22 }
 0x110   :  { %v2176_v8 = vsel %vm394_vm15, 1.0, %v2705_v22 }
 0x111   :  { %2515 = vmatprep.mubr.msk.f32.mxu1 %vm544_vm0, %v2176_v8  ;;  %v1187_v9 = vpop.permute.xlu1 %1186 }
 0x112   :  { %2516 = vmatmul.mubr.msk.f32.gmra.mrb[34].mxu1 %vm544_vm0, %v2177_v7  ;;  %v1184_v10 = vpop.permute.xlu0 %1183  ;;  %vm1239_vm1 = vcmp.eq.s32.totalorder %v3004_v17, %v1187_v9 }
 0x113   :  { %vm1238_vm2 = vcmp.eq.s32.totalorder %v3004_v17, %v1184_v10  ;;  %v2275_v11 = vsel %vm1239_vm1, 1.0, %v2705_v22  ;;  %v45_v10 = vld [vmem:[%s3711_s8] sm:$0x1]  ;;  %s2706_s8 = smov [#allocation2]  }
 0x114   :  { %v2274_v12 = vsel %vm1238_vm2, 1.0, %v2705_v22 }
 0x115   :  { %2570 = vmatprep.mubr.msk.f32.mxu0 %vm1316_vm3, %v2274_v12  ;;  %v313_v13 = vpop.permute.xlu1 %312 }
 0x116   :  { %2571 = vmatmul.mubr.msk.f32.gmra.mrb[20].mxu0 %vm1316_vm3, %v2275_v11  ;;  %v310_v15 = vpop.permute.xlu0 %309  ;;  %vm397_vm4 = vcmp.eq.s32.totalorder %v3004_v17, %v313_v13 }
 0x117   :  { %vm396_vm5 = vcmp.eq.s32.totalorder %v3004_v17, %v310_v15  ;;  %v2179_v16 = vsel %vm397_vm4, 1.0, %v2705_v22  ;;  %v51_v15 = vld [vmem:[%s3713_s10] sm:$0x1] }
 0x118   :  { %v2178_v18 = vsel %vm396_vm5, 1.0, %v2705_v22 }
 0x119   :  { %2518 = vmatprep.mubr.msk.f32.mxu1 %vm544_vm0, %v2178_v18  ;;  %v1193_v19 = vpop.permute.xlu1 %1192 }
 0x11a   :  { %2519 = vmatmul.mubr.msk.f32.gmra.mrb[36].mxu1 %vm544_vm0, %v2179_v16  ;;  %v1190_v20 = vpop.permute.xlu0 %1189  ;;  %vm1241_vm6 = vcmp.eq.s32.totalorder %v3004_v17, %v1193_v19  ;;  %v3417_v16 = vshrl.u32 %v150_v14, 7  ;;  %v50_v19 = vld [vmem:[%s3712_s9] sm:$0x1]  ;;  %s2104_s9 = sshll.u32 %s2706_s8, 4  ;;  %s2105_s9 = int_to_ptr.vmem [resolvable:$true] %s2104_s9 }
 0x11b   :  { %vm1240_vm7 = vcmp.eq.s32.totalorder %v3004_v17, %v1190_v20  ;;  %v2277_v21 = vsel %vm1241_vm6, 1.0, %v2705_v22  ;;  %s2656_s10 = scalar_lea.vmem %s2105_s9, 16  ;;  %s2660_s22 = scalar_lea.vmem %s2105_s9, 32 }
 0x11c   :  { %v2276_v23 = vsel %vm1240_vm7, 1.0, %v2705_v22  ;;  %v1673_v20 = vsub.s32 0, %v3417_v16  ;;  %p2657_p0 = scmp.ne.s32.totalorder %s2105_s9, %s2656_s10  ;;  %p2661_p1 = scmp.lt.s32.totalorder %s2105_s9, %s2105_s9 }
 0x11d   :  { %2573 = vmatprep.mubr.msk.f32.mxu0 %vm1316_vm3, %v2276_v23  ;;  %v319_v24 = vpop.permute.xlu1 %318  ;;  %p2662_p2 = scmp.lt.s32.totalorder %s2660_s22, %s2656_s10 }
 0x11e   :  { %2574 = vmatmul.mubr.msk.f32.gmra.mrb[22].mxu0 %vm1316_vm3, %v2277_v21  ;;  %v316_v25 = vpop.permute.xlu0 %315  ;;  %vm399_vm8 = vcmp.eq.s32.totalorder %v3004_v17, %v319_v24 }
 0x11f   :  { %vm398_vm9 = vcmp.eq.s32.totalorder %v3004_v17, %v316_v25  ;;  %v2181_v26 = vsel %vm399_vm8, 1.0, %v2705_v22  ;;  %p2663_p3 = por %p2662_p2, %p2661_p1 }
 0x120   :  { %v2180_v27 = vsel %vm398_vm9, 1.0, %v2705_v22 }
 0x121   :  { %2521 = vmatprep.mubr.msk.f32.mxu1 %vm544_vm0, %v2180_v27  ;;  %v1199_v28 = vpop.permute.xlu1 %1198  ;;  %p2664_p4 = pnand %p2663_p3, %p2657_p0 }
 0x122   :  { %2522 = vmatmul.mubr.msk.f32.gmra.mrb[38].mxu1 %vm544_vm0, %v2181_v26  ;;  %v1196_v29 = vpop.permute.xlu0 %1195  ;;  %vm1243_vm10 = vcmp.eq.s32.totalorder %v3004_v17, %v1199_v28 }
 0x123   :  { %vm1242_vm11 = vcmp.eq.s32.totalorder %v3004_v17, %v1196_v29  ;;  %v2279_v30 = vsel %vm1243_vm10, 1.0, %v2705_v22 }
 0x124   :  { %v2278_v31 = vsel %vm1242_vm11, 1.0, %v2705_v22 }
 0x125   :  { %2576 = vmatprep.mubr.msk.f32.mxu0 %vm1316_vm3, %v2278_v31  ;;  %v325_v32 = vpop.permute.xlu1 %324 }
 0x126   :  { %2577 = vmatmul.mubr.msk.f32.gmra.mrb[24].mxu0 %vm1316_vm3, %v2279_v30  ;;  %v322_v33 = vpop.permute.xlu0 %321  ;;  %vm401_vm12 = vcmp.eq.s32.totalorder %v3004_v17, %v325_v32 }
 0x127   :  { %vm400_vm13 = vcmp.eq.s32.totalorder %v3004_v17, %v322_v33  ;;  %v2183_v34 = vsel %vm401_vm12, 1.0, %v2705_v22  ;;  %vm1913_vm12 = vcmask 261312  }
 0x128   :  { %v2182_v35 = vsel %vm400_vm13, 1.0, %v2705_v22  ;;  %vm1920_vm13 = vcmask 326912  }
 0x129   :  { %2524 = vmatprep.mubr.msk.f32.mxu1 %vm544_vm0, %v2182_v35  ;;  %v1205_v36 = vpop.permute.xlu1 %1204 }
 0x12a   :  { %2525 = vmatmul.mubr.msk.f32.gmra.mrb[40].mxu1 %vm544_vm0, %v2183_v34  ;;  %v1202_v37 = vpop.permute.xlu0 %1201  ;;  %vm1245_vm14 = vcmp.eq.s32.totalorder %v3004_v17, %v1205_v36 }
 0x12b   :  { %vm1244_vm15 = vcmp.eq.s32.totalorder %v3004_v17, %v1202_v37  ;;  %v2281_v38 = vsel %vm1245_vm14, 1.0, %v2705_v22  ;;  %vm1927_vm14 = vcmask 392512  }
 0x12c   :  { %v2280_v39 = vsel %vm1244_vm15, 1.0, %v2705_v22  ;;  %vm1934_vm15 = vcmask 458112  }
 0x12d   :  { %2579 = vmatprep.mubr.msk.f32.mxu0 %vm1316_vm3, %v2280_v39  ;;  %v331_v40 = vpop.permute.xlu1 %330 }
 0x12e   :  { %2580 = vmatmul.mubr.msk.f32.gmra.mrb[26].mxu0 %vm1316_vm3, %v2281_v38  ;;  %v328_v41 = vpop.permute.xlu0 %327  ;;  %vm403_vm1 = vcmp.eq.s32.totalorder %v3004_v17, %v331_v40 }
 0x12f   :  { %vm402_vm2 = vcmp.eq.s32.totalorder %v3004_v17, %v328_v41  ;;  %v2185_v42 = vsel %vm403_vm1, 1.0, %v2705_v22  ;;  %vm1941_vm1 = vcmask 523712  }
 0x130   :  { %v2184_v43 = vsel %vm402_vm2, 1.0, %v2705_v22  ;;  %vm1948_vm2 = vcmask 589312  }
 0x131   :  { %2527 = vmatprep.mubr.msk.f32.mxu1 %vm544_vm0, %v2184_v43  ;;  %v1211_v44 = vpop.permute.xlu1 %1210 }
 0x132   :  { %2528 = vmatmul.mubr.msk.f32.gmra.mrb[42].mxu1 %vm544_vm0, %v2185_v42  ;;  %v1208_v45 = vpop.permute.xlu0 %1207  ;;  %vm1247_vm4 = vcmp.eq.s32.totalorder %v3004_v17, %v1211_v44 }
 0x133   :  { %vm1246_vm5 = vcmp.eq.s32.totalorder %v3004_v17, %v1208_v45  ;;  %v2283_v46 = vsel %vm1247_vm4, 1.0, %v2705_v22  ;;  %vm1955_vm4 = vcmask 654912  }
 0x134   :  { %v2282_v47 = vsel %vm1246_vm5, 1.0, %v2705_v22  ;;  %vm1962_vm5 = vcmask 720512  }
 0x135   :  { %2582 = vmatprep.mubr.msk.f32.mxu0 %vm1316_vm3, %v2282_v47  ;;  %v337_v48 = vpop.permute.xlu1 %336 }
 0x136   :  { %2583 = vmatmul.mubr.msk.f32.gmra.mrb[28].mxu0 %vm1316_vm3, %v2283_v46  ;;  %v334_v49 = vpop.permute.xlu0 %333  ;;  %vm405_vm6 = vcmp.eq.s32.totalorder %v3004_v17, %v337_v48 }
 0x137   :  { %vm404_vm7 = vcmp.eq.s32.totalorder %v3004_v17, %v334_v49  ;;  %v2187_v50 = vsel %vm405_vm6, 1.0, %v2705_v22  ;;  %vm1969_vm6 = vcmask 786112  }
 0x138   :  { %v2186_v51 = vsel %vm404_vm7, 1.0, %v2705_v22  ;;  %vm1976_vm7 = vcmask 851712  }
 0x139   :  { %2530 = vmatprep.mubr.msk.f32.mxu1 %vm544_vm0, %v2186_v51  ;;  %v1217_v52 = vpop.permute.xlu1 %1216 }
 0x13a   :  { %2531 = vmatmul.mubr.msk.f32.gmra.mrb[44].mxu1 %vm544_vm0, %v2187_v50  ;;  %v1214_v53 = vpop.permute.xlu0 %1213  ;;  %vm1249_vm8 = vcmp.eq.s32.totalorder %v3004_v17, %v1217_v52 }
 0x13b   :  { %vm1248_vm9 = vcmp.eq.s32.totalorder %v3004_v17, %v1214_v53  ;;  %v2285_v54 = vsel %vm1249_vm8, 1.0, %v2705_v22  ;;  %vm1983_vm8 = vcmask 917312  }
 0x13c   :  { %v2284_v55 = vsel %vm1248_vm9, 1.0, %v2705_v22  ;;  %vm1990_vm9 = vcmask 982912  }
 0x13d   :  { %2585 = vmatprep.mubr.msk.f32.mxu0 %vm1316_vm3, %v2284_v55  ;;  %v343_v56 = vpop.permute.xlu1 %342 }
 0x13e   :  { %2586 = vmatmul.mubr.msk.f32.gmra.mrb[30].mxu0 %vm1316_vm3, %v2285_v54  ;;  %v340_v57 = vpop.permute.xlu0 %339  ;;  %vm407_vm10 = vcmp.eq.s32.totalorder %v3004_v17, %v343_v56  ;;  %vm1906_vm3 = vcmask 195712  }
 0x13f   :  { %vm406_vm11 = vcmp.eq.s32.totalorder %v3004_v17, %v340_v57  ;;  %v2189_v58 = vsel %vm407_vm10, 1.0, %v2705_v22  ;;  %vm1997_vm10 = vcmask 1048512  }
 0x140   :  { %v2188_v59 = vsel %vm406_vm11, 1.0, %v2705_v22  ;;  %v47_v22 = vadd.f32 1e-05, %v46_v4 }
 0x141   :  { %2533 = vmatprep.mubr.msk.f32.mxu1 %vm544_vm0, %v2188_v59 }
 0x142   :  { %2534 = vmatmul.mubr.msk.f32.gmra.mrb[46].mxu1 %vm544_vm0, %v2189_v58  ;;  %2654 = vrsqrt.f32 %v47_v22  ;;  %vm1899_vm0 = vcmask 130112  }
 0x14c   :  { %v2655_v9 = vpop.eup %2654 }
 0x14d   :  { %v49_v13 = vmul.f32 %v2655_v9, %v45_v10 }
 0x14f   :  { %v52_v18 = vmul.f32 %v51_v15, %v49_v13  ;;  %v3427_v25 = vrot.slane %v49_v13, %v1673_v20 }
 0x151   :  { %v53_v24 = vsub.f32 %v50_v19, %v52_v18 }
 0x153   :  { %v3429_v29 = vrot.slane %v53_v24, %v1673_v20 }
 0x15b   :  { %v2466_v60 = vpop.f32.mrb[0].mxu1 }
 0x15c   :  { %v883_v61 = vpop.f32.mrb[1].mxu1 }
 0x165   :  { %v2469_v62 = vpop.f32.mrb[2].mxu1 }
 0x166   :  { %v893_v63 = vpop.f32.mrb[3].mxu1 }
 0x16d   :  { %v2472_v0 = vpop.f32.mrb[4].mxu1 }
 0x16e   :  { %v903_v1 = vpop.f32.mrb[5].mxu1 }
 0x175   :  { %v3391_v2 = vpop.f32.mrb[6].mxu1 }
 0x176   :  { %v3393_v3 = vpop.f32.mrb[7].mxu1 }
 0x17d   :  { %v3398_v5 = vpop.f32.mrb[8].mxu1 }
 0x17e   :  { %v3400_v6 = vpop.f32.mrb[9].mxu1 }
 0x185   :  { %v3402_v7 = vpop.f32.mrb[10].mxu1 }
 0x186   :  { %v3404_v8 = vpop.f32.mrb[11].mxu1 }
 0x18d   :  { %v3409_v11 = vpop.f32.mrb[12].mxu1 }
 0x18e   :  { %v3411_v12 = vpop.f32.mrb[13].mxu1 }
 0x195   :  { %v3423_v21 = vpop.f32.mrb[14].mxu1 }
 0x196   :  { %v3425_v23 = vpop.f32.mrb[15].mxu1 }
 0x199   :  { %v2542_v26 = vpop.f32.mrb[0].mxu0 }
 0x19a   :  { %v1655_v27 = vsub.f32 %v2542_v26, %v2466_v60  ;;  %v1479_v28 = vpop.f32.mrb[1].mxu0 }
 0x19b   :  { %v1654_v14 = vsub.f32 %v1479_v28, %v883_v61 }
 0x19c   :  { %v1677_v30 = vmul.f32 %v3427_v25, %v1655_v27 }
 0x19d   :  { %v1676_v31 = vmul.f32 %v3427_v25, %v1654_v14  ;;  %v3433_v32 = vpop.f32.mrb[16].mxu1 }
 0x19e   :  { %v3435_v33 = vpop.f32.mrb[17].mxu1  ;;  %v1699_v34 = vadd.f32 %v3429_v29, %v1677_v30 }
 0x19f   :  { %v1698_v35 = vadd.f32 %v3429_v29, %v1676_v31 }
 0x1a0   :  { %v1715_v36 = vand.u32 2147483647, %v1699_v34 }
 0x1a1   :  { %v2545_v37 = vpop.f32.mrb[2].mxu0  ;;  %v1714_v38 = vand.u32 2147483647, %v1698_v35 }
 0x1a2   :  { %v1657_v39 = vsub.f32 %v2545_v37, %v2469_v62  ;;  %v1489_v40 = vpop.f32.mrb[3].mxu0  ;;  %1732 = vadd.xlane.f32.xlu1 %v1715_v36 }
 0x1a3   :  { %v1656_v41 = vsub.f32 %v1489_v40, %v893_v63  ;;  %1730 = vadd.xlane.f32.xlu0 %v1714_v38 }
 0x1a4   :  { %v1679_v42 = vmul.f32 %v3427_v25, %v1657_v39 }
 0x1a5   :  { %v1678_v43 = vmul.f32 %v3427_v25, %v1656_v41  ;;  %v3441_v44 = vpop.f32.mrb[18].mxu1 }
 0x1a6   :  { %v3443_v45 = vpop.f32.mrb[19].mxu1  ;;  %v1701_v46 = vadd.f32 %v3429_v29, %v1679_v42 }
 0x1a7   :  { %v1700_v48 = vadd.f32 %v3429_v29, %v1678_v43 }
 0x1a8   :  { %v1717_v47 = vand.u32 2147483647, %v1701_v46 }
 0x1a9   :  { %v2548_v49 = vpop.f32.mrb[4].mxu0  ;;  %v1716_v54 = vand.u32 2147483647, %v1700_v48 }
 0x1aa   :  { %v1659_v50 = vsub.f32 %v2548_v49, %v2472_v0  ;;  %v1499_v51 = vpop.f32.mrb[5].mxu0  ;;  %1736 = vadd.xlane.f32.xlu1 %v1717_v47 }
 0x1ab   :  { %v1658_v52 = vsub.f32 %v1499_v51, %v903_v1 }
 0x1ac   :  { %v1681_v53 = vmul.f32 %v3427_v25, %v1659_v50 }
 0x1ad   :  { %v1680_v55 = vmul.f32 %v3427_v25, %v1658_v52  ;;  %v3449_v56 = vpop.f32.mrb[20].mxu1 }
 0x1ae   :  { %v3451_v57 = vpop.f32.mrb[21].mxu1  ;;  %1734 = vadd.xlane.f32.xlu1 %v1716_v54  ;;  %v1703_v58 = vadd.f32 %v3429_v29, %v1681_v53 }
 0x1af   :  { %v1702_v60 = vadd.f32 %v3429_v29, %v1680_v55 }
 0x1b0   :  { %v1719_v59 = vand.u32 2147483647, %v1703_v58 }
 0x1b1   :  { %v2551_v61 = vpop.f32.mrb[6].mxu0  ;;  %v1718_v4 = vand.u32 2147483647, %v1702_v60 }
 0x1b2   :  { %v1661_v62 = vsub.f32 %v2551_v61, %v3391_v2  ;;  %v1509_v63 = vpop.f32.mrb[7].mxu0  ;;  %1740 = vadd.xlane.f32.xlu1 %v1719_v59 }
 0x1b3   :  { %v1660_v0 = vsub.f32 %v1509_v63, %v3393_v3 }
 0x1b4   :  { %v1683_v1 = vmul.f32 %v3427_v25, %v1661_v62 }
 0x1b5   :  { %v1682_v22 = vmul.f32 %v3427_v25, %v1660_v0  ;;  %v3459_v9 = vpop.f32.mrb[22].mxu1 }
 0x1b6   :  { %v3461_v10 = vpop.f32.mrb[23].mxu1  ;;  %1738 = vadd.xlane.f32.xlu1 %v1718_v4  ;;  %v1705_v13 = vadd.f32 %v3429_v29, %v1683_v1 }
 0x1b7   :  { %v1704_v18 = vadd.f32 %v3429_v29, %v1682_v22 }
 0x1b8   :  { %v1721_v15 = vand.u32 2147483647, %v1705_v13 }
 0x1b9   :  { %v2554_v2 = vpop.f32.mrb[8].mxu0  ;;  %v1720_v26 = vand.u32 2147483647, %v1704_v18 }
 0x1ba   :  { %v1663_v19 = vsub.f32 %v2554_v2, %v3398_v5  ;;  %v1519_v20 = vpop.f32.mrb[9].mxu0  ;;  %1744 = vadd.xlane.f32.xlu1 %v1721_v15 }
 0x1bb   :  { %v1662_v3 = vsub.f32 %v1519_v20, %v3400_v6 }
 0x1bc   :  { %v1685_v24 = vmul.f32 %v3427_v25, %v1663_v19 }
 0x1bd   :  { %v1684_v27 = vmul.f32 %v3427_v25, %v1662_v3  ;;  %v3469_v28 = vpop.f32.mrb[24].mxu1 }
 0x1be   :  { %v3471_v14 = vpop.f32.mrb[25].mxu1  ;;  %1742 = vadd.xlane.f32.xlu1 %v1720_v26  ;;  %v1707_v30 = vadd.f32 %v3429_v29, %v1685_v24 }
 0x1bf   :  { %v1706_v34 = vadd.f32 %v3429_v29, %v1684_v27 }
 0x1c0   :  { %v1723_v31 = vand.u32 2147483647, %v1707_v30 }
 0x1c1   :  { %v2557_v5 = vpop.f32.mrb[10].mxu0  ;;  %v1722_v38 = vand.u32 2147483647, %v1706_v34 }
 0x1c2   :  { %v1665_v35 = vsub.f32 %v2557_v5, %v3402_v7  ;;  %v1529_v36 = vpop.f32.mrb[11].mxu0  ;;  %1748 = vadd.xlane.f32.xlu1 %v1723_v31 }
 0x1c3   :  { %v1664_v6 = vsub.f32 %v1529_v36, %v3404_v8 }
 0x1c4   :  { %v1687_v37 = vmul.f32 %v3427_v25, %v1665_v35 }
 0x1c5   :  { %v1686_v39 = vmul.f32 %v3427_v25, %v1664_v6  ;;  %v3479_v40 = vpop.f32.mrb[26].mxu1 }
 0x1c6   :  { %v3481_v41 = vpop.f32.mrb[27].mxu1  ;;  %1746 = vadd.xlane.f32.xlu1 %v1722_v38  ;;  %v1709_v42 = vadd.f32 %v3429_v29, %v1687_v37 }
 0x1c7   :  { %v1708_v46 = vadd.f32 %v3429_v29, %v1686_v39 }
 0x1c8   :  { %v1725_v43 = vand.u32 2147483647, %v1709_v42 }
 0x1c9   :  { %v2560_v7 = vpop.f32.mrb[12].mxu0  ;;  %v1724_v50 = vand.u32 2147483647, %v1708_v46 }
 0x1ca   :  { %v1667_v47 = vsub.f32 %v2560_v7, %v3409_v11  ;;  %v1539_v48 = vpop.f32.mrb[13].mxu0  ;;  %1752 = vadd.xlane.f32.xlu1 %v1725_v43 }
 0x1cb   :  { %v1666_v8 = vsub.f32 %v1539_v48, %v3411_v12 }
 0x1cc   :  { %v1689_v49 = vmul.f32 %v3427_v25, %v1667_v47 }
 0x1cd   :  { %v1688_v51 = vmul.f32 %v3427_v25, %v1666_v8  ;;  %v3489_v52 = vpop.f32.mrb[28].mxu1 }
 0x1ce   :  { %v3491_v53 = vpop.f32.mrb[29].mxu1  ;;  %1750 = vadd.xlane.f32.xlu1 %v1724_v50  ;;  %v1711_v54 = vadd.f32 %v3429_v29, %v1689_v49 }
 0x1cf   :  { %v1710_v58 = vadd.f32 %v3429_v29, %v1688_v51 }
 0x1d0   :  { %v1727_v55 = vand.u32 2147483647, %v1711_v54 }
 0x1d1   :  { %v2563_v11 = vpop.f32.mrb[14].mxu0  ;;  %v1726_v61 = vand.u32 2147483647, %v1710_v58 }
 0x1d2   :  { %v1669_v59 = vsub.f32 %v2563_v11, %v3423_v21  ;;  %v1549_v60 = vpop.f32.mrb[15].mxu0  ;;  %1756 = vadd.xlane.f32.xlu1 %v1727_v55 }
 0x1d3   :  { %v1668_v12 = vsub.f32 %v1549_v60, %v3425_v23 }
 0x1d4   :  { %v1691_v62 = vmul.f32 %v3427_v25, %v1669_v59 }
 0x1d5   :  { %v1690_v63 = vmul.f32 %v3427_v25, %v1668_v12  ;;  %v3499_v0 = vpop.f32.mrb[30].mxu1 }
 0x1d6   :  { %v3501_v1 = vpop.f32.mrb[31].mxu1  ;;  %1754 = vadd.xlane.f32.xlu1 %v1726_v61  ;;  %v1713_v21 = vadd.f32 %v3429_v29, %v1691_v62 }
 0x1d7   :  { %v1712_v4 = vadd.f32 %v3429_v29, %v1690_v63 }
 0x1d8   :  { %v1729_v19 = vand.u32 2147483647, %v1713_v21 }
 0x1d9   :  { %v2566_v22 = vpop.f32.mrb[16].mxu0  ;;  %v1728_v13 = vand.u32 2147483647, %v1712_v4 }
 0x1da   :  { %v1763_v15 = vadd.f32 %v2566_v22, %v3433_v32  ;;  %v1559_v18 = vpop.f32.mrb[17].mxu0 }
 0x1db   :  { %v1762_v23 = vadd.f32 %v1559_v18, %v3435_v33  ;;  %1758 = vadd.xlane.f32.xlu1 %v1728_v13 }
 0x1dd   :  { %v2514_v2 = vpop.f32.mrb[32].mxu1 }
 0x1de   :  { %v1779_v20 = vsub.f32 %v1763_v15, %v2514_v2  ;;  %v1043_v3 = vpop.f32.mrb[33].mxu1 }
 0x1df   :  { %v1778_v24 = vsub.f32 %v1762_v23, %v1043_v3  ;;  %1760 = vadd.xlane.f32.xlu1 %v1729_v19 }
 0x1e0   :  { %v1795_v26 = vmul.f32 %v1779_v20, %v3427_v25 }
 0x1e1   :  { %v1794_v27 = vmul.f32 %v1778_v24, %v3427_v25  ;;  %v2569_v30 = vpop.f32.mrb[18].mxu0 }
 0x1e2   :  { %v1765_v31 = vadd.f32 %v2569_v30, %v3441_v44  ;;  %v1569_v34 = vpop.f32.mrb[19].mxu0  ;;  %v1811_v32 = vadd.f32 %v1795_v26, %v3429_v29 }
 0x1e3   :  { %v1764_v5 = vadd.f32 %v1569_v34, %v3443_v45  ;;  %v1810_v35 = vadd.f32 %v1794_v27, %v3429_v29 }
 0x1e4   :  { %v1827_v33 = vand.u32 2147483647, %v1811_v32 }
 0x1e5   :  { %v2517_v36 = vpop.f32.mrb[34].mxu1  ;;  %v1826_v42 = vand.u32 2147483647, %v1810_v35 }
 0x1e6   :  { %v1781_v6 = vsub.f32 %v1765_v31, %v2517_v36  ;;  %v1053_v37 = vpop.f32.mrb[35].mxu1  ;;  %1844 = vadd.xlane.f32.xlu0 %v1827_v33 }
 0x1e7   :  { %v1780_v38 = vsub.f32 %v1764_v5, %v1053_v37 }
 0x1e8   :  { %v1797_v39 = vmul.f32 %v1781_v6, %v3427_v25 }
 0x1e9   :  { %v1796_v43 = vmul.f32 %v1780_v38, %v3427_v25  ;;  %v2572_v46 = vpop.f32.mrb[20].mxu0 }
 0x1ea   :  { %v1767_v44 = vadd.f32 %v2572_v46, %v3449_v56  ;;  %v1579_v7 = vpop.f32.mrb[21].mxu0  ;;  %1842 = vadd.xlane.f32.xlu0 %v1826_v42  ;;  %v1813_v45 = vadd.f32 %v1797_v39, %v3429_v29 }
 0x1eb   :  { %v1766_v47 = vadd.f32 %v1579_v7, %v3451_v57  ;;  %v1812_v8 = vadd.f32 %v1796_v43, %v3429_v29 }
 0x1ec   :  { %v1829_v48 = vand.u32 2147483647, %v1813_v45 }
 0x1ed   :  { %v2520_v49 = vpop.f32.mrb[36].mxu1  ;;  %v1828_v58 = vand.u32 2147483647, %v1812_v8 }
 0x1ee   :  { %v1783_v50 = vsub.f32 %v1767_v44, %v2520_v49  ;;  %v1063_v51 = vpop.f32.mrb[37].mxu1  ;;  %1848 = vadd.xlane.f32.xlu0 %v1829_v48 }
 0x1ef   :  { %v1782_v54 = vsub.f32 %v1766_v47, %v1063_v51 }
 0x1f0   :  { %v1799_v55 = vmul.f32 %v1783_v50, %v3427_v25 }
 0x1f1   :  { %v1798_v11 = vmul.f32 %v1782_v54, %v3427_v25  ;;  %v2575_v56 = vpop.f32.mrb[22].mxu0 }
 0x1f2   :  { %v1769_v59 = vadd.f32 %v2575_v56, %v3459_v9  ;;  %v1589_v60 = vpop.f32.mrb[23].mxu0  ;;  %1846 = vadd.xlane.f32.xlu0 %v1828_v58  ;;  %v1815_v57 = vadd.f32 %v1799_v55, %v3429_v29 }
 0x1f3   :  { %v1768_v12 = vadd.f32 %v1589_v60, %v3461_v10  ;;  %v1814_v62 = vadd.f32 %v1798_v11, %v3429_v29 }
 0x1f4   :  { %v1831_v61 = vand.u32 2147483647, %v1815_v57 }
 0x1f5   :  { %v2523_v63 = vpop.f32.mrb[38].mxu1  ;;  %v1830_v15 = vand.u32 2147483647, %v1814_v62 }
 0x1f6   :  { %v1785_v4 = vsub.f32 %v1769_v59, %v2523_v63  ;;  %v1073_v22 = vpop.f32.mrb[39].mxu1  ;;  %1852 = vadd.xlane.f32.xlu0 %v1831_v61 }
 0x1f7   :  { %v1784_v13 = vsub.f32 %v1768_v12, %v1073_v22 }
 0x1f8   :  { %v1801_v21 = vmul.f32 %v1785_v4, %v3427_v25 }
 0x1f9   :  { %v1800_v18 = vmul.f32 %v1784_v13, %v3427_v25  ;;  %v2578_v9 = vpop.f32.mrb[24].mxu0 }
 0x1fa   :  { %v1771_v23 = vadd.f32 %v2578_v9, %v3469_v28  ;;  %v1599_v2 = vpop.f32.mrb[25].mxu0  ;;  %1850 = vadd.xlane.f32.xlu0 %v1830_v15  ;;  %v1817_v10 = vadd.f32 %v1801_v21, %v3429_v29 }
 0x1fb   :  { %v1770_v19 = vadd.f32 %v1599_v2, %v3471_v14  ;;  %v1816_v3 = vadd.f32 %v1800_v18, %v3429_v29 }
 0x1fc   :  { %v1833_v20 = vand.u32 2147483647, %v1817_v10 }
 0x1fd   :  { %v2526_v24 = vpop.f32.mrb[40].mxu1  ;;  %v1832_v34 = vand.u32 2147483647, %v1816_v3  ;;  %v1894_v3 = vadd.s32 4294967288, %v3004_v17 }
 0x1fe   :  { %v1787_v26 = vsub.f32 %v1771_v23, %v2526_v24  ;;  %v1083_v27 = vpop.f32.mrb[41].mxu1  ;;  %1856 = vadd.xlane.f32.xlu0 %v1833_v20  ;;  %v1901_v24 = vadd.s32 4294967280, %v3004_v17 }
 0x1ff   :  { %v1786_v30 = vsub.f32 %v1770_v19, %v1083_v27 }
 0x200   :  { %v1803_v31 = vmul.f32 %v1787_v26, %v3427_v25  ;;  %v3556_v26 = vsub.s32 %v1894_v3, %v3417_v16 }
 0x201   :  { %v1802_v32 = vmul.f32 %v1786_v30, %v3427_v25  ;;  %v2581_v28 = vpop.f32.mrb[26].mxu0  ;;  %v3563_v30 = vsub.s32 %v1901_v24, %v3417_v16 }
 0x202   :  { %v1773_v5 = vadd.f32 %v2581_v28, %v3479_v40  ;;  %v1609_v33 = vpop.f32.mrb[27].mxu0  ;;  %1854 = vadd.xlane.f32.xlu0 %v1832_v34  ;;  %v1819_v14 = vadd.f32 %v1803_v31, %v3429_v29  ;;  %v1915_v31 = vadd.s32 4294967264, %v3004_v17  ;;  %v1908_v34 = vadd.s32 4294967272, %v3004_v17 }
 0x203   :  { %v1772_v35 = vadd.f32 %v1609_v33, %v3481_v41  ;;  %v1818_v6 = vadd.f32 %v1802_v32, %v3429_v29 }
 0x204   :  { %v1835_v36 = vand.u32 2147483647, %v1819_v14  ;;  %v3571_v14 = vsub.s32 %v1915_v31, %v3417_v16 }
 0x205   :  { %v2529_v37 = vpop.f32.mrb[42].mxu1  ;;  %v1834_v46 = vand.u32 2147483647, %v1818_v6  ;;  %v1922_v6 = vadd.s32 4294967256, %v3004_v17 }
 0x206   :  { %v1789_v38 = vsub.f32 %v1773_v5, %v2529_v37  ;;  %v1093_v39 = vpop.f32.mrb[43].mxu1  ;;  %1860 = vadd.xlane.f32.xlu0 %v1835_v36  ;;  %v3575_v36 = vsub.s32 %v1908_v34, %v3417_v16 }
 0x207   :  { %v1788_v42 = vsub.f32 %v1772_v35, %v1093_v39  ;;  %v1929_v35 = vadd.s32 4294967248, %v3004_v17 }
 0x208   :  { %v1805_v43 = vmul.f32 %v1789_v38, %v3427_v25 }
 0x209   :  { %v1804_v44 = vmul.f32 %v1788_v42, %v3427_v25  ;;  %v2584_v40 = vpop.f32.mrb[28].mxu0 }
 0x20a   :  { %v1775_v7 = vadd.f32 %v2584_v40, %v3489_v52  ;;  %v1619_v45 = vpop.f32.mrb[29].mxu0  ;;  %1858 = vadd.xlane.f32.xlu0 %v1834_v46  ;;  %v1821_v41 = vadd.f32 %v1805_v43, %v3429_v29  ;;  %v3582_v43 = vsub.s32 %v1929_v35, %v3417_v16  ;;  %v1943_v46 = vadd.s32 4294967232, %v3004_v17 }
 0x20b   :  { %v1774_v47 = vadd.f32 %v1619_v45, %v3491_v53  ;;  %v1820_v8 = vadd.f32 %v1804_v44, %v3429_v29  ;;  %v3587_v40 = vsub.s32 %v1922_v6, %v3417_v16 }
 0x20c   :  { %v1837_v48 = vand.u32 2147483647, %v1821_v41 }
 0x20d   :  { %v2532_v49 = vpop.f32.mrb[44].mxu1  ;;  %v1836_v58 = vand.u32 2147483647, %v1820_v8  ;;  %v3594_v8 = vsub.s32 %v1943_v46, %v3417_v16 }
 0x20e   :  { %v1791_v50 = vsub.f32 %v1775_v7, %v2532_v49  ;;  %v1103_v51 = vpop.f32.mrb[45].mxu1  ;;  %1864 = vadd.xlane.f32.xlu0 %v1837_v48  ;;  %v1936_v7 = vadd.s32 4294967240, %v3004_v17  ;;  %v1957_v49 = vadd.s32 4294967216, %v3004_v17 }
 0x20f   :  { %v1790_v54 = vsub.f32 %v1774_v47, %v1103_v51 }
 0x210   :  { %v1807_v55 = vmul.f32 %v1791_v50, %v3427_v25  ;;  %v3599_v51 = vsub.s32 %v1936_v7, %v3417_v16 }
 0x211   :  { %v1806_v11 = vmul.f32 %v1790_v54, %v3427_v25  ;;  %v2587_v52 = vpop.f32.mrb[30].mxu0  ;;  %v1950_v54 = vadd.s32 4294967224, %v3004_v17 }
 0x212   :  { %v1777_v56 = vadd.f32 %v2587_v52, %v3499_v0  ;;  %v1629_v59 = vpop.f32.mrb[31].mxu0  ;;  %1862 = vadd.xlane.f32.xlu0 %v1836_v58  ;;  %v1823_v53 = vadd.f32 %v1807_v55, %v3429_v29 }
 0x213   :  { %v1776_v60 = vadd.f32 %v1629_v59, %v3501_v1  ;;  %v1822_v12 = vadd.f32 %v1806_v11, %v3429_v29  ;;  %v1971_v59 = vadd.s32 4294967200, %v3004_v17 }
 0x214   :  { %v1839_v57 = vand.u32 2147483647, %v1823_v53 }
 0x215   :  { %v2535_v61 = vpop.f32.mrb[46].mxu1  ;;  %v1838_v22 = vand.u32 2147483647, %v1822_v12 }
 0x216   :  { %v1793_v62 = vsub.f32 %v1777_v56, %v2535_v61  ;;  %v1113_v63 = vpop.f32.mrb[47].mxu1  ;;  %1868 = vadd.xlane.f32.xlu0 %v1839_v57  ;;  %v3606_v56 = vsub.s32 %v1957_v49, %v3417_v16  ;;  %v1964_v57 = vadd.s32 4294967208, %v3004_v17 }
 0x217   :  { %v1792_v4 = vsub.f32 %v1776_v60, %v1113_v63  ;;  %v3611_v60 = vsub.s32 %v1950_v54, %v3417_v16 }
 0x218   :  { %v1809_v13 = vmul.f32 %v1793_v62, %v3427_v25 }
 0x219   :  { %v1808_v21 = vmul.f32 %v1792_v4, %v3427_v25  ;;  %v3618_v4 = vsub.s32 %v1971_v59, %v3417_v16 }
 0x21a   :  { %1866 = vadd.xlane.f32.xlu0 %v1838_v22  ;;  %v1825_v18 = vadd.f32 %v1809_v13, %v3429_v29  ;;  %v1985_v22 = vadd.s32 4294967184, %v3004_v17 }
 0x21b   :  { %v1824_v0 = vadd.f32 %v1808_v21, %v3429_v29  ;;  %v3560_v29 = vsub.s32 %v3004_v17, %v3417_v16  ;;  %v3623_v21 = vsub.s32 %v1964_v57, %v3417_v16 }
 0x21c   :  { %v1841_v1 = vand.u32 2147483647, %v1825_v18 }
 0x21d   :  { %v1840_v15 = vand.u32 2147483647, %v1824_v0  ;;  %v1978_v0 = vadd.s32 4294967192, %v3004_v17 }
 0x21f   :  { %1870 = vadd.xlane.f32.xlu0 %v1840_v15 }
 0x223   :  { %1872 = vadd.xlane.f32.xlu0 %v1841_v1  ;;  %v1992_v1 = vadd.s32 4294967176, %v3004_v17 }
 0x225   :  { %v3639_v24 = vsub.s32 %v1992_v1, %v3417_v16 }
 0x22f   :  { %v1733_v9 = vpop.xlane.xlu1 %1732 }
 0x230   :  { %v1731_v27 = vpop.xlane.xlu0 %1730  ;;  %v1898_v28 = vrot.slane %v1733_v9, %v3556_v26 }
 0x231   :  { %v1893_v5 = vrot.slane %v1731_v27, %v3560_v29 }
 0x233   :  { %v1900_v38 = vsel %vm1899_vm0, %v1898_v28, %v1893_v5 }
 0x237   :  { %v1737_v23 = vpop.xlane.xlu1 %1736 }
 0x238   :  { %v1912_v44 = vrot.slane %v1737_v23, %v3575_v36 }
 0x23b   :  { %v1735_v2 = vpop.xlane.xlu1 %1734 }
 0x23c   :  { %v1905_v33 = vrot.slane %v1735_v2, %v3563_v30  ;;  %v3631_v2 = vsub.s32 %v1985_v22, %v3417_v16 }
 0x23e   :  { %v1907_v39 = vsel %vm1906_vm3, %v1905_v33, %v1900_v38 }
 0x23f   :  { %v1741_v10 = vpop.xlane.xlu1 %1740  ;;  %v1914_v41 = vsel %vm1913_vm12, %v1912_v44, %v1907_v39 }
 0x240   :  { %v1926_v50 = vrot.slane %v1741_v10, %v3587_v40 }
 0x243   :  { %v1739_v19 = vpop.xlane.xlu1 %1738 }
 0x244   :  { %v1919_v42 = vrot.slane %v1739_v19, %v3571_v14  ;;  %v3635_v19 = vsub.s32 %v1978_v0, %v3417_v16 }
 0x246   :  { %v1921_v47 = vsel %vm1920_vm13, %v1919_v42, %v1914_v41 }
 0x247   :  { %v1745_v20 = vpop.xlane.xlu1 %1744  ;;  %v1928_v58 = vsel %vm1927_vm14, %v1926_v50, %v1921_v47 }
 0x248   :  { %v1940_v53 = vrot.slane %v1745_v20, %v3599_v51 }
 0x24b   :  { %v1743_v25 = vpop.xlane.xlu1 %1742 }
 0x24c   :  { %v1933_v48 = vrot.slane %v1743_v25, %v3582_v43 }
 0x24e   :  { %v1935_v11 = vsel %vm1934_vm15, %v1933_v48, %v1928_v58 }
 0x24f   :  { %v1749_v32 = vpop.xlane.xlu1 %1748  ;;  %v1942_v61 = vsel %vm1941_vm1, %v1940_v53, %v1935_v11 }
 0x250   :  { %v1954_v13 = vrot.slane %v1749_v32, %v3611_v60 }
 0x253   :  { %v1747_v37 = vpop.xlane.xlu1 %1746 }
 0x254   :  { %v1947_v52 = vrot.slane %v1747_v37, %v3594_v8 }
 0x256   :  { %v1949_v62 = vsel %vm1948_vm2, %v1947_v52, %v1942_v61 }
 0x257   :  { %v1753_v45 = vpop.xlane.xlu1 %1752  ;;  %v1956_v18 = vsel %vm1955_vm4, %v1954_v13, %v1949_v62 }
 0x258   :  { %v1968_v10 = vrot.slane %v1753_v45, %v3623_v21 }
 0x25b   :  { %v1751_v55 = vpop.xlane.xlu1 %1750 }
 0x25c   :  { %v1961_v63 = vrot.slane %v1751_v55, %v3606_v56 }
 0x25e   :  { %v1963_v9 = vsel %vm1962_vm5, %v1961_v63, %v1956_v18 }
 0x25f   :  { %v1757_v12 = vpop.xlane.xlu1 %1756  ;;  %v1970_v3 = vsel %vm1969_vm6, %v1968_v10, %v1963_v9 }
 0x260   :  { %v1982_v27 = vrot.slane %v1757_v12, %v3635_v19 }
 0x263   :  { %v1755_v15 = vpop.xlane.xlu1 %1754 }
 0x264   :  { %v1975_v23 = vrot.slane %v1755_v15, %v3618_v4 }
 0x266   :  { %v1977_v17 = vsel %vm1976_vm7, %v1975_v23, %v1970_v3 }
 0x267   :  { %v1984_v32 = vsel %vm1983_vm8, %v1982_v27, %v1977_v17 }
 0x268   :  { %v1759_v20 = vpop.xlane.xlu1 %1758 }
 0x269   :  { %v1989_v25 = vrot.slane %v1759_v20, %v3631_v2 }
 0x26b   :  { %v1991_v28 = vsel %vm1990_vm9, %v1989_v25, %v1984_v32 }
 0x26c   :  { %v1761_v31 = vpop.xlane.xlu1 %1760 }
 0x26d   :  { %v1996_v34 = vrot.slane %v1761_v31, %v3639_v24 }
 0x26f   :  { %v1998_v16 = vsel %vm1997_vm10, %v1996_v34, %v1991_v28 }
 0x270   :  { %2000 = vst [vmem:[#allocation2] sm:$0x1] %v1998_v16 }
 0x271   :  { %2667 = shalt.err (!%p2664_p4)
}
 0x272   :  { %s2668_s6 = scalar_lea.hbm %s3715_s12, 16 }
 0x273   :  { %p2669_p5 = scmp.ne.s32.totalorder %s3715_s12, %s2668_s6  ;;  %p2672_p6 = scmp.lt.u32.totalorder %s2668_s6, %s3715_s12 }
 0x275   :  { %p2674_p7 = pnand %p2672_p6, %p2669_p5 }
 0x277   :  { %2677 = shalt.err (!%p2674_p7)
}
 0x278   :  { %2107 = dma.vmem_to_hbm [thread:$0]  %s2105_s9, 16, %s3715_s12, [#allocation3]   ;;  %v1845_v5 = vpop.xlane.xlu0 %1844 }
 0x279   :  { %v2024_v45 = vrot.slane %v1845_v5, %v3556_v26  ;;  %s2707_s12 = smov [#allocation4]  }
 0x27a   :  { %s2114_s27 = sshll.u32 %s2707_s12, 4  ;;  %s2115_s27 = int_to_ptr.vmem [resolvable:$true] %s2114_s27 }
 0x27b   :  { %s2678_s28 = scalar_lea.vmem %s2115_s27, 16  ;;  %s2682_s29 = scalar_lea.vmem %s2115_s27, 32 }
 0x27c   :  { %v1843_v33 = vpop.xlane.xlu0 %1842  ;;  %p2679_p8 = scmp.ne.s32.totalorder %s2115_s27, %s2678_s28  ;;  %p2683_p9 = scmp.lt.s32.totalorder %s2115_s27, %s2115_s27 }
 0x27d   :  { %v2020_v44 = vrot.slane %v1843_v33, %v3560_v29  ;;  %p2684_p10 = scmp.lt.s32.totalorder %s2682_s29, %s2678_s28 }
 0x27f   :  { %v2025_v47 = vsel %vm1899_vm0, %v2024_v45, %v2020_v44  ;;  %p2685_p11 = por %p2684_p10, %p2683_p9 }
 0x280   :  { %v1849_v35 = vpop.xlane.xlu0 %1848 }
 0x281   :  { %v2034_v50 = vrot.slane %v1849_v35, %v3575_v36  ;;  %p2686_p12 = pnand %p2685_p11, %p2679_p8 }
 0x284   :  { %v1847_v6 = vpop.xlane.xlu0 %1846 }
 0x285   :  { %v2029_v7 = vrot.slane %v1847_v6, %v3563_v30 }
 0x287   :  { %v2030_v48 = vsel %vm1906_vm3, %v2029_v7, %v2025_v47 }
 0x288   :  { %v1853_v37 = vpop.xlane.xlu0 %1852  ;;  %v2035_v55 = vsel %vm1913_vm12, %v2034_v50, %v2030_v48 }
 0x289   :  { %v2044_v30 = vrot.slane %v1853_v37, %v3587_v40 }
 0x28c   :  { %v1851_v38 = vpop.xlane.xlu0 %1850 }
 0x28d   :  { %v2039_v49 = vrot.slane %v1851_v38, %v3571_v14 }
 0x28f   :  { %v2040_v58 = vsel %vm1920_vm13, %v2039_v49, %v2035_v55 }
 0x290   :  { %v1857_v39 = vpop.xlane.xlu0 %1856  ;;  %v2045_v26 = vsel %vm1927_vm14, %v2044_v30, %v2040_v58 }
 0x291   :  { %v2054_v14 = vrot.slane %v1857_v39, %v3599_v51 }
 0x294   :  { %v1855_v42 = vpop.xlane.xlu0 %1854 }
 0x295   :  { %v2049_v29 = vrot.slane %v1855_v42, %v3582_v43 }
 0x297   :  { %v2050_v52 = vsel %vm1934_vm15, %v2049_v29, %v2045_v26 }
 0x298   :  { %v1861_v46 = vpop.xlane.xlu0 %1860  ;;  %v2055_v36 = vsel %vm1941_vm1, %v2054_v14, %v2050_v52 }
 0x299   :  { %v2064_v43 = vrot.slane %v1861_v46, %v3611_v60 }
 0x29c   :  { %v1859_v41 = vpop.xlane.xlu0 %1858 }
 0x29d   :  { %v2059_v59 = vrot.slane %v1859_v41, %v3594_v8 }
 0x29f   :  { %v2060_v57 = vsel %vm1948_vm2, %v2059_v59, %v2055_v36 }
 0x2a0   :  { %v1865_v54 = vpop.xlane.xlu0 %1864  ;;  %v2065_v40 = vsel %vm1955_vm4, %v2064_v43, %v2060_v57 }
 0x2a1   :  { %v2074_v8 = vrot.slane %v1865_v54, %v3623_v21 }
 0x2a4   :  { %v1863_v11 = vpop.xlane.xlu0 %1862 }
 0x2a5   :  { %v2069_v12 = vrot.slane %v1863_v11, %v3606_v56 }
 0x2a7   :  { %v2070_v62 = vsel %vm1962_vm5, %v2069_v12, %v2065_v40 }
 0x2a8   :  { %v1869_v53 = vpop.xlane.xlu0 %1868  ;;  %v2075_v51 = vsel %vm1969_vm6, %v2074_v8, %v2070_v62 }
 0x2a9   :  { %v2084_v56 = vrot.slane %v1869_v53, %v3635_v19 }
 0x2ac   :  { %v1867_v61 = vpop.xlane.xlu0 %1866 }
 0x2ad   :  { %v2079_v63 = vrot.slane %v1867_v61, %v3618_v4 }
 0x2af   :  { %v2080_v13 = vsel %vm1976_vm7, %v2079_v63, %v2075_v51 }
 0x2b0   :  { %v1871_v22 = vpop.xlane.xlu0 %1870  ;;  %v2085_v18 = vsel %vm1983_vm8, %v2084_v56, %v2080_v13 }
 0x2b1   :  { %v2089_v0 = vrot.slane %v1871_v22, %v3631_v2 }
 0x2b3   :  { %v2090_v4 = vsel %vm1990_vm9, %v2089_v0, %v2085_v18 }
 0x2b4   :  { %v1873_v60 = vpop.xlane.xlu0 %1872 }
 0x2b5   :  { %v2094_v15 = vrot.slane %v1873_v60, %v3639_v24 }
 0x2b7   :  { %v2095_v21 = vsel %vm1997_vm10, %v2094_v15, %v2090_v4 }
 0x2b8   :  { %2097 = vst [vmem:[#allocation4] sm:$0x1] %v2095_v21 }
 0x2b9   :  { %2689 = shalt.err (!%p2686_p12)
}
 0x2ba   :  { %s2690_s15 = scalar_lea.hbm %s3716_s13, 16 }
 0x2bb   :  { %p2691_p13 = scmp.ne.s32.totalorder %s3716_s13, %s2690_s15  ;;  %p2694_p0 = scmp.lt.u32.totalorder %s2690_s15, %s3716_s13 }
 0x2bd   :  { %p2696_p1 = pnand %p2694_p0, %p2691_p13 }
 0x2bf   :  { %2699 = shalt.err (!%p2696_p1)
}
 0x2c0   :  { %2117 = dma.vmem_to_hbm [thread:$0]  %s2115_s27, 16, %s3716_s13, [#allocation5]  }
 0x2c1   :  { %2700 = dma.done.wait [#allocation3], 16  }
 0x2c2   :  { %2701 = vsyncadd [#allocation3], 4294967280 }
 0x2c3   :  { %2702 = dma.done.wait [#allocation5], 16  }
 0x2c4   :  { %2703 = vsyncadd [#allocation5], 4294967280 }
 0x2c5   :  { %2124 = vsyncpa [#allocation3], 1 }
 0x2c6   :  { %2125 = vsyncpa [#allocation5], 1 }

</bundles_post_ra>
